<compile_context>
chip_gen: v6e
topology: v6e:2x2x1
jax: 0.10.0
libtpu: 0.0.40
codegen_flags: <defaults>
</compile_context>

<pallas_src>
import functools

import jax
import jax.numpy as jnp
from jax.experimental import pallas as pl
from jax.experimental.pallas import tpu as pltpu


def _round_up(a, m):
    return -(-a // m) * m


def _device_kind():
    try:
        return jax.devices()[0].device_kind.lower()
    except Exception:
        return ""


# -----------------------------------------------------------------------------
# Kernel
# -----------------------------------------------------------------------------
def _mlp_gaze_kernel(n_layers, skip, hidden_acc,
                     x_ref, w0_ref, wsk_ref, wh_ref, b_ref, wr_ref, br_ref,
                     rgb_ref, dens_ref):
    """One row tile: (TM, C) -> (TM, H//2) rgb, (TM, H) density.

    wh_ref[i-1] holds layer i's (H, H) weight for i = 1..n_layers-1; layer
    skip+1's slot holds only the hidden part W[C:, :].  The input part
    W[:C, :] is wsk_ref and is applied as an extra small K=C matmul at that
    layer, since cat([x, h]) @ W == x @ W[:C] + h @ W[C:].  The input tile
    x_ref is resident in VMEM for the whole step, so no skip carry is held.
    """
    cdt = x_ref.dtype                      # compute dtype (bf16 or f32)
    x = x_ref[...]

    # Layer 0.
    y = (jnp.dot(x, w0_ref[...], preferred_element_type=hidden_acc)
         + b_ref[pl.ds(0, 1), :].astype(hidden_acc))
    h = jnp.maximum(y, 0.0).astype(cdt)

    for i in range(1, n_layers):
        last = i == n_layers - 1
        acc = jnp.float32 if last else hidden_acc
        y = (jnp.dot(h, wh_ref[i - 1], preferred_element_type=acc)
             + b_ref[pl.ds(i, 1), :].astype(acc))
        if i == skip + 1:
            # cat([x, h], channel) @ W  ==  x @ W[:C]  +  h @ W[C:]
            y = y + jnp.dot(x, wsk_ref[...], preferred_element_type=acc)
        y = jnp.maximum(y, 0.0)
        if last:
            dens_ref[...] = y.astype(dens_ref.dtype)
        h = y.astype(cdt)

    # RGB head: Gaze_RGB_layer_0's output is overwritten in the torch forward;
    # only relu(Gaze_RGB_layer_1(x)) reaches the returned rgb_feat.
    rgb = jnp.maximum(
        jnp.dot(h, wr_ref[...], preferred_element_type=jnp.float32)
        + br_ref[...].astype(jnp.float32), 0.0)
    rgb_ref[...] = rgb.astype(rgb_ref.dtype)


# -----------------------------------------------------------------------------
# Parameter initialization (deterministic, Xavier-uniform weights)
# -----------------------------------------------------------------------------
def init_params(key, gaze_channels, n_layers=8, h_channel=256):
    C, H = gaze_channels, h_channel
    skips = [n_layers // 2]

    def xavier(key, cin, cout):
        limit = (6.0 / (cin + cout)) ** 0.5
        return jax.random.uniform(key, (cin, cout), jnp.float32, -limit, limit)

    def bias(key, cin, cout):
        bound = 1.0 / (cin ** 0.5)
        return jax.random.uniform(key, (1, cout), jnp.float32, -bound, bound)

    keys = jax.random.split(key, 2 * (n_layers + 1) + 2)
    ki = iter(range(len(keys)))
    params = {}

    params["w0"] = xavier(keys[next(ki)], C, H)
    params["b0"] = bias(keys[next(ki)], C, H)
    for i in range(1, n_layers):
        cin = H + C if (i - 1) in skips else H
        params[f"w{i}"] = xavier(keys[next(ki)], cin, H)
        params[f"b{i}"] = bias(keys[next(ki)], cin, H)
    # RGB head (Gaze_RGB_layer_1; layer_0 is dead code in the forward)
    params["wr"] = xavier(keys[next(ki)], H, H // 2)
    params["br"] = bias(keys[next(ki)], H, H // 2)
    return params


# -----------------------------------------------------------------------------
# Wrapper
# -----------------------------------------------------------------------------
def mlp_for_gaze(x_nchw, params, gaze_channels, n_layers=8, h_channel=256, *,
                 tm=None, compute_dtype=jnp.bfloat16, out_dtype=None,
                 channels_last=False, bf16_epilogue=None,
                 vmem_limit_bytes=None):
    B, C, Nr, Ns = x_nchw.shape
    assert C == gaze_channels
    H = h_channel
    skip = n_layers // 2
    assert 0 < skip + 1 < n_layers, "wrapper assumes an interior skip layer"
    M = B * Nr * Ns
    out_dtype = x_nchw.dtype if out_dtype is None else out_dtype

    kind = _device_kind()
    is_v5 = "v5" in kind
    is_v7 = ("v7" in kind) or ("tpu7" in kind) or ("7x" in kind)

    # ---- per-chip defaults ---------------------------------------------------
    if tm is None:
        # Big tiles amortize the ~0.35us/step overhead; v5e's scoped-VMEM
        # default is smaller and it is MXU-bound, so keep its tiles smaller.
        tm = 1024 if is_v5 else 2048
    if bf16_epilogue is None:
        # bf16 bias+ReLU keeps the VALU slot from binding on v6e/v7x (bf16
        # VALU).  v5e has no bf16 VALU and is MXU-bound: keep f32 epilogue.
        bf16_epilogue = (jnp.dtype(compute_dtype) == jnp.dtype(jnp.bfloat16)
                         and not is_v5)
    hidden_acc = jnp.bfloat16 if bf16_epilogue else jnp.float32

    # ---- row tile selection (multiple of 128 keeps bf16 tiles native) --------
    tm_eff = min(tm, _round_up(M, 128))
    num_tiles = -(-M // tm_eff)
    if is_v7 and num_tiles == 1 and M >= 256:
        # >= 2 (even) grid steps so the "parallel" row axis spans both
        # TensorCores on v7x.  On 1-TC chips this would only add overhead.
        tm_eff = _round_up(-(-M // 2), 128)
        num_tiles = -(-M // tm_eff)
    M_pad = num_tiles * tm_eff

    # ---- NCHW -> (M, C), channels in lanes; cast for the MXU -----------------
    x2d = jnp.transpose(x_nchw, (0, 2, 3, 1)).reshape(M, C).astype(compute_dtype)
    if M_pad != M:
        x2d = jnp.pad(x2d, ((0, M_pad - M), (0, 0)))

    # ---- pack weights (few operands -> few DMA descriptors) ------------------
    w_skip = params[f"w{skip + 1}"]                       # (C + H, H)
    w0 = params["w0"].astype(compute_dtype)               # (C, H)
    wsk_in = w_skip[:C, :].astype(compute_dtype)          # (C, H), input part
    wh = jnp.stack(
        [w_skip[C:, :] if i == skip + 1 else params[f"w{i}"]
         for i in range(1, n_layers)], axis=0).astype(compute_dtype)  # (L-1,H,H)
    b = jnp.concatenate([params[f"b{i}"] for i in range(n_layers)],
                        axis=0).astype(compute_dtype)     # (n_layers, H)
    wr = params["wr"].astype(compute_dtype)               # (H, H//2)
    br = params["br"].astype(compute_dtype)               # (1, H//2)
    weight_args = [w0, wsk_in, wh, b, wr, br]

    # ---- specs -----------------------------------------------------------------
    row_spec = lambda width: pl.BlockSpec((tm_eff, width), lambda i: (i, 0))

    def const_spec(arr):
        zeros = (0,) * arr.ndim
        return pl.BlockSpec(arr.shape, lambda i, _z=zeros: _z)

    in_specs = [row_spec(C)] + [const_spec(a) for a in weight_args]
    out_specs = (row_spec(H // 2), row_spec(H))
    out_shape = (jax.ShapeDtypeStruct((M_pad, H // 2), out_dtype),
                 jax.ShapeDtypeStruct((M_pad, H), out_dtype))

    # ---- cost estimate & VMEM budget -------------------------------------------
    cdt_b = jnp.dtype(compute_dtype).itemsize
    out_b = jnp.dtype(out_dtype).itemsize
    w_elems = ((n_layers - 1) * H * H + 2 * C * H + H * (H // 2)
               + n_layers * H + (H // 2))
    flops = 2 * M * (2 * C * H + (n_layers - 1) * H * H + H * (H // 2))
    cost = pl.CostEstimate(
        flops=flops, transcendentals=0,
        bytes_accessed=(M * C * cdt_b + M * (H + H // 2) * out_b
                        + w_elems * cdt_b))

    if vmem_limit_bytes is None:
        est = (2 * tm_eff * max(C, 128) * cdt_b          # input, double-buffered
               + 2 * tm_eff * (H + H // 2) * out_b       # outputs, double-buffered
               + 2 * w_elems * cdt_b                     # weights
               + 6 * tm_eff * max(H, 128) * 4)           # temporaries headroom
        cap = (56 << 20) if is_v7 else (100 << 20)       # v7x: 64 MiB physical/TC
        vmem_limit_bytes = int(min(max(est, 32 << 20), cap))

    kernel = functools.partial(_mlp_gaze_kernel, n_layers, skip, hidden_acc)
    rgb2d, dens2d = pl.pallas_call(
        kernel,
        grid=(num_tiles,),
        in_specs=in_specs,
        out_specs=out_specs,
        out_shape=out_shape,
        cost_estimate=cost,
        compiler_params=pltpu.CompilerParams(
            dimension_semantics=("parallel",),
            vmem_limit_bytes=vmem_limit_bytes),
    )(x2d, *weight_args)

    rgb = rgb2d[:M].reshape(B, Nr, Ns, H // 2)
    dens = dens2d[:M].reshape(B, Nr, Ns, H)
    if channels_last:
        # NHWC output: skips the post-kernel NCHW transposes (pure HBM
        # round-trips) when the consumer can accept channels-last.
        return rgb, dens
    return rgb.transpose(0, 3, 1, 2), dens.transpose(0, 3, 1, 2)


# -----------------------------------------------------------------------------
# Pure-JAX reference (mirrors the PyTorch forward exactly, f32)
# -----------------------------------------------------------------------------
def reference_forward(x_nchw, params, gaze_channels, n_layers=8, h_channel=256):
    B, C, Nr, Ns = x_nchw.shape
    skips = [n_layers // 2]
    x2d = jnp.transpose(x_nchw, (0, 2, 3, 1)).reshape(-1, C)
    xin = x2d
    x = x2d
    for i in range(n_layers):
        x = jnp.maximum(x @ params[f"w{i}"] + params[f"b{i}"], 0.0)
        if i in skips:
            x = jnp.concatenate([xin, x], axis=-1)
    dens = x
    rgb = jnp.maximum(x @ params["wr"] + params["br"], 0.0)
    H = h_channel
    dens = dens.reshape(B, Nr, Ns, H).transpose(0, 3, 1, 2)
    rgb = rgb.reshape(B, Nr, Ns, H // 2).transpose(0, 3, 1, 2)
    return rgb, dens


# -----------------------------------------------------------------------------
if __name__ == "__main__":
    # Small, deterministic configuration (correctness smoke test).
    gaze_channels = 8
    n_layers = 8
    h_channel = 32
    B, Nr, Ns = 2, 8, 16                 # M = B*Nr*Ns = 256 rows

    key = jax.random.PRNGKey(0)
    kp, kx = jax.random.split(key)
    params = init_params(kp, gaze_channels, n_layers, h_channel)
    x = jax.random.normal(kx, (B, gaze_channels, Nr, Ns), dtype=jnp.float32)

    rgb_ref, dens_ref = reference_forward(x, params, gaze_channels, n_layers,
                                          h_channel)

    # 1) exact-semantics check: f32 compute path, tight tolerance.
    rgb32, dens32 = mlp_for_gaze(x, params, gaze_channels, n_layers, h_channel,
                                 compute_dtype=jnp.float32)
    jax.block_until_ready((rgb32, dens32))
    assert rgb32.shape == (B, h_channel // 2, Nr, Ns)
    assert dens32.shape == (B, h_channel, Nr, Ns)
    assert jnp.allclose(rgb32, rgb_ref, atol=1e-5, rtol=1e-5)
    assert jnp.allclose(dens32, dens_ref, atol=1e-5, rtol=1e-5)

    # 2) fast path: bf16 matmuls (bf16 epilogue auto-selected on v6e/v7x).
    #    Loose tolerance vs the f32 reference; structural correctness is
    #    already pinned down by the f32 check above.
    rgb16, dens16 = mlp_for_gaze(x, params, gaze_channels, n_layers, h_channel)
    jax.block_until_ready((rgb16, dens16))
    assert rgb16.shape == (B, h_channel // 2, Nr, Ns)
    assert dens16.shape == (B, h_channel, Nr, Ns)
    assert jnp.allclose(rgb16, rgb_ref, atol=1e-1, rtol=1e-1)
    assert jnp.allclose(dens16, dens_ref, atol=1e-1, rtol=1e-1)

    print("KERNEL_OK")
</pallas_src>

<mosaic_0001>
module attributes {stable_mosaic.version = 11 : i64} {
  func.func @_mlp_gaze_kernel(%arg0: i32, %arg1: memref<256x8xf32, #tpu.memory_space<vmem>>, %arg2: memref<8x32xf32, #tpu.memory_space<vmem>>, %arg3: memref<8x32xf32, #tpu.memory_space<vmem>>, %arg4: memref<7x32x32xf32, #tpu.memory_space<vmem>>, %arg5: memref<8x32xf32, #tpu.memory_space<vmem>>, %arg6: memref<32x16xf32, #tpu.memory_space<vmem>>, %arg7: memref<1x16xf32, #tpu.memory_space<vmem>>, %arg8: memref<256x16xf32, #tpu.memory_space<vmem>>, %arg9: memref<256x32xf32, #tpu.memory_space<vmem>>) attributes {dimension_semantics = [#tpu.dimension_semantics<parallel>], iteration_bounds = array<i64: 1>, scalar_prefetch = 0 : i64, scratch_operands = 0 : i64, tpu.core_type = #tpu.core_type<tc>, window_params = [{transform_indices = @transform_0, window_bounds = array<i64: 256, 8>}, {pipeline_mode = #tpu.pipeline_mode<synchronous>, transform_indices = @transform_1, window_bounds = array<i64: 8, 32>}, {pipeline_mode = #tpu.pipeline_mode<synchronous>, transform_indices = @transform_2, window_bounds = array<i64: 8, 32>}, {pipeline_mode = #tpu.pipeline_mode<synchronous>, transform_indices = @transform_3, window_bounds = array<i64: 7, 32, 32>}, {pipeline_mode = #tpu.pipeline_mode<synchronous>, transform_indices = @transform_4, window_bounds = array<i64: 8, 32>}, {pipeline_mode = #tpu.pipeline_mode<synchronous>, transform_indices = @transform_5, window_bounds = array<i64: 32, 16>}, {pipeline_mode = #tpu.pipeline_mode<synchronous>, transform_indices = @transform_6, window_bounds = array<i64: 1, 16>}, {transform_indices = @transform_7, window_bounds = array<i64: 256, 16>}, {transform_indices = @transform_8, window_bounds = array<i64: 256, 32>}]} {
    %c0 = arith.constant 0 : index
    %c0_0 = arith.constant 0 : index
    %0 = vector.load %arg1[%c0, %c0_0] : memref<256x8xf32, #tpu.memory_space<vmem>>, vector<256x8xf32>
    %c0_1 = arith.constant 0 : index
    %c0_2 = arith.constant 0 : index
    %1 = vector.load %arg2[%c0_1, %c0_2] : memref<8x32xf32, #tpu.memory_space<vmem>>, vector<8x32xf32>
    %cst = arith.constant dense<0.000000e+00> : vector<256x32xf32>
    %2 = tpu.matmul %0, %1, %cst {dimension_numbers = #tpu.dot_dimension_numbers<[1], [0], [0], [1], [0, 0, 1, 1], [], []>} : vector<256x8xf32>, vector<8x32xf32>, vector<256x32xf32> -> vector<256x32xf32>
    %c0_3 = arith.constant 0 : index
    %c0_4 = arith.constant 0 : index
    %3 = vector.load %arg5[%c0_3, %c0_4] : memref<8x32xf32, #tpu.memory_space<vmem>>, vector<1x32xf32>
    %4 = vector.broadcast %3 : vector<1x32xf32> to vector<256x32xf32>
    %5 = arith.addf %2, %4 : vector<256x32xf32>
    %cst_5 = arith.constant 0.000000e+00 : f32
    %6 = vector.broadcast %cst_5 : f32 to vector<256x32xf32>
    %7 = arith.maximumf %5, %6 : vector<256x32xf32>
    %c0_6 = arith.constant 0 : index
    %c0_7 = arith.constant 0 : index
    %c0_8 = arith.constant 0 : index
    %8 = vector.load %arg4[%c0_6, %c0_7, %c0_8] : memref<7x32x32xf32, #tpu.memory_space<vmem>>, vector<1x32x32xf32>
    %9 = vector.shape_cast %8 : vector<1x32x32xf32> to vector<32x32xf32>
    %cst_9 = arith.constant dense<0.000000e+00> : vector<256x32xf32>
    %10 = tpu.matmul %7, %9, %cst_9 {dimension_numbers = #tpu.dot_dimension_numbers<[1], [0], [0], [1], [0, 0, 1, 1], [], []>} : vector<256x32xf32>, vector<32x32xf32>, vector<256x32xf32> -> vector<256x32xf32>
    %c1 = arith.constant 1 : index
    %c0_10 = arith.constant 0 : index
    %11 = vector.load %arg5[%c1, %c0_10] : memref<8x32xf32, #tpu.memory_space<vmem>>, vector<1x32xf32>
    %12 = vector.broadcast %11 : vector<1x32xf32> to vector<256x32xf32>
    %13 = arith.addf %10, %12 : vector<256x32xf32>
    %cst_11 = arith.constant 0.000000e+00 : f32
    %14 = vector.broadcast %cst_11 : f32 to vector<256x32xf32>
    %15 = arith.maximumf %13, %14 : vector<256x32xf32>
    %c1_12 = arith.constant 1 : index
    %c0_13 = arith.constant 0 : index
    %c0_14 = arith.constant 0 : index
    %16 = vector.load %arg4[%c1_12, %c0_13, %c0_14] : memref<7x32x32xf32, #tpu.memory_space<vmem>>, vector<1x32x32xf32>
    %17 = vector.shape_cast %16 : vector<1x32x32xf32> to vector<32x32xf32>
    %cst_15 = arith.constant dense<0.000000e+00> : vector<256x32xf32>
    %18 = tpu.matmul %15, %17, %cst_15 {dimension_numbers = #tpu.dot_dimension_numbers<[1], [0], [0], [1], [0, 0, 1, 1], [], []>} : vector<256x32xf32>, vector<32x32xf32>, vector<256x32xf32> -> vector<256x32xf32>
    %c2 = arith.constant 2 : index
    %c0_16 = arith.constant 0 : index
    %19 = vector.load %arg5[%c2, %c0_16] : memref<8x32xf32, #tpu.memory_space<vmem>>, vector<1x32xf32>
    %20 = vector.broadcast %19 : vector<1x32xf32> to vector<256x32xf32>
    %21 = arith.addf %18, %20 : vector<256x32xf32>
    %cst_17 = arith.constant 0.000000e+00 : f32
    %22 = vector.broadcast %cst_17 : f32 to vector<256x32xf32>
    %23 = arith.maximumf %21, %22 : vector<256x32xf32>
    %c2_18 = arith.constant 2 : index
    %c0_19 = arith.constant 0 : index
    %c0_20 = arith.constant 0 : index
    %24 = vector.load %arg4[%c2_18, %c0_19, %c0_20] : memref<7x32x32xf32, #tpu.memory_space<vmem>>, vector<1x32x32xf32>
    %25 = vector.shape_cast %24 : vector<1x32x32xf32> to vector<32x32xf32>
    %cst_21 = arith.constant dense<0.000000e+00> : vector<256x32xf32>
    %26 = tpu.matmul %23, %25, %cst_21 {dimension_numbers = #tpu.dot_dimension_numbers<[1], [0], [0], [1], [0, 0, 1, 1], [], []>} : vector<256x32xf32>, vector<32x32xf32>, vector<256x32xf32> -> vector<256x32xf32>
    %c3 = arith.constant 3 : index
    %c0_22 = arith.constant 0 : index
    %27 = vector.load %arg5[%c3, %c0_22] : memref<8x32xf32, #tpu.memory_space<vmem>>, vector<1x32xf32>
    %28 = vector.broadcast %27 : vector<1x32xf32> to vector<256x32xf32>
    %29 = arith.addf %26, %28 : vector<256x32xf32>
    %cst_23 = arith.constant 0.000000e+00 : f32
    %30 = vector.broadcast %cst_23 : f32 to vector<256x32xf32>
    %31 = arith.maximumf %29, %30 : vector<256x32xf32>
    %c3_24 = arith.constant 3 : index
    %c0_25 = arith.constant 0 : index
    %c0_26 = arith.constant 0 : index
    %32 = vector.load %arg4[%c3_24, %c0_25, %c0_26] : memref<7x32x32xf32, #tpu.memory_space<vmem>>, vector<1x32x32xf32>
    %33 = vector.shape_cast %32 : vector<1x32x32xf32> to vector<32x32xf32>
    %cst_27 = arith.constant dense<0.000000e+00> : vector<256x32xf32>
    %34 = tpu.matmul %31, %33, %cst_27 {dimension_numbers = #tpu.dot_dimension_numbers<[1], [0], [0], [1], [0, 0, 1, 1], [], []>} : vector<256x32xf32>, vector<32x32xf32>, vector<256x32xf32> -> vector<256x32xf32>
    %c4 = arith.constant 4 : index
    %c0_28 = arith.constant 0 : index
    %35 = vector.load %arg5[%c4, %c0_28] : memref<8x32xf32, #tpu.memory_space<vmem>>, vector<1x32xf32>
    %36 = vector.broadcast %35 : vector<1x32xf32> to vector<256x32xf32>
    %37 = arith.addf %34, %36 : vector<256x32xf32>
    %cst_29 = arith.constant 0.000000e+00 : f32
    %38 = vector.broadcast %cst_29 : f32 to vector<256x32xf32>
    %39 = arith.maximumf %37, %38 : vector<256x32xf32>
    %c4_30 = arith.constant 4 : index
    %c0_31 = arith.constant 0 : index
    %c0_32 = arith.constant 0 : index
    %40 = vector.load %arg4[%c4_30, %c0_31, %c0_32] : memref<7x32x32xf32, #tpu.memory_space<vmem>>, vector<1x32x32xf32>
    %41 = vector.shape_cast %40 : vector<1x32x32xf32> to vector<32x32xf32>
    %cst_33 = arith.constant dense<0.000000e+00> : vector<256x32xf32>
    %42 = tpu.matmul %39, %41, %cst_33 {dimension_numbers = #tpu.dot_dimension_numbers<[1], [0], [0], [1], [0, 0, 1, 1], [], []>} : vector<256x32xf32>, vector<32x32xf32>, vector<256x32xf32> -> vector<256x32xf32>
    %c5 = arith.constant 5 : index
    %c0_34 = arith.constant 0 : index
    %43 = vector.load %arg5[%c5, %c0_34] : memref<8x32xf32, #tpu.memory_space<vmem>>, vector<1x32xf32>
    %44 = vector.broadcast %43 : vector<1x32xf32> to vector<256x32xf32>
    %45 = arith.addf %42, %44 : vector<256x32xf32>
    %c0_35 = arith.constant 0 : index
    %c0_36 = arith.constant 0 : index
    %46 = vector.load %arg3[%c0_35, %c0_36] : memref<8x32xf32, #tpu.memory_space<vmem>>, vector<8x32xf32>
    %cst_37 = arith.constant dense<0.000000e+00> : vector<256x32xf32>
    %47 = tpu.matmul %0, %46, %cst_37 {dimension_numbers = #tpu.dot_dimension_numbers<[1], [0], [0], [1], [0, 0, 1, 1], [], []>} : vector<256x8xf32>, vector<8x32xf32>, vector<256x32xf32> -> vector<256x32xf32>
    %48 = arith.addf %45, %47 : vector<256x32xf32>
    %cst_38 = arith.constant 0.000000e+00 : f32
    %49 = vector.broadcast %cst_38 : f32 to vector<256x32xf32>
    %50 = arith.maximumf %48, %49 : vector<256x32xf32>
    %c5_39 = arith.constant 5 : index
    %c0_40 = arith.constant 0 : index
    %c0_41 = arith.constant 0 : index
    %51 = vector.load %arg4[%c5_39, %c0_40, %c0_41] : memref<7x32x32xf32, #tpu.memory_space<vmem>>, vector<1x32x32xf32>
    %52 = vector.shape_cast %51 : vector<1x32x32xf32> to vector<32x32xf32>
    %cst_42 = arith.constant dense<0.000000e+00> : vector<256x32xf32>
    %53 = tpu.matmul %50, %52, %cst_42 {dimension_numbers = #tpu.dot_dimension_numbers<[1], [0], [0], [1], [0, 0, 1, 1], [], []>} : vector<256x32xf32>, vector<32x32xf32>, vector<256x32xf32> -> vector<256x32xf32>
    %c6 = arith.constant 6 : index
    %c0_43 = arith.constant 0 : index
    %54 = vector.load %arg5[%c6, %c0_43] : memref<8x32xf32, #tpu.memory_space<vmem>>, vector<1x32xf32>
    %55 = vector.broadcast %54 : vector<1x32xf32> to vector<256x32xf32>
    %56 = arith.addf %53, %55 : vector<256x32xf32>
    %cst_44 = arith.constant 0.000000e+00 : f32
    %57 = vector.broadcast %cst_44 : f32 to vector<256x32xf32>
    %58 = arith.maximumf %56, %57 : vector<256x32xf32>
    %c6_45 = arith.constant 6 : index
    %c0_46 = arith.constant 0 : index
    %c0_47 = arith.constant 0 : index
    %59 = vector.load %arg4[%c6_45, %c0_46, %c0_47] : memref<7x32x32xf32, #tpu.memory_space<vmem>>, vector<1x32x32xf32>
    %60 = vector.shape_cast %59 : vector<1x32x32xf32> to vector<32x32xf32>
    %cst_48 = arith.constant dense<0.000000e+00> : vector<256x32xf32>
    %61 = tpu.matmul %58, %60, %cst_48 {dimension_numbers = #tpu.dot_dimension_numbers<[1], [0], [0], [1], [0, 0, 1, 1], [], []>} : vector<256x32xf32>, vector<32x32xf32>, vector<256x32xf32> -> vector<256x32xf32>
    %c7 = arith.constant 7 : index
    %c0_49 = arith.constant 0 : index
    %62 = vector.load %arg5[%c7, %c0_49] : memref<8x32xf32, #tpu.memory_space<vmem>>, vector<1x32xf32>
    %63 = vector.broadcast %62 : vector<1x32xf32> to vector<256x32xf32>
    %64 = arith.addf %61, %63 : vector<256x32xf32>
    %cst_50 = arith.constant 0.000000e+00 : f32
    %65 = vector.broadcast %cst_50 : f32 to vector<256x32xf32>
    %66 = arith.maximumf %64, %65 : vector<256x32xf32>
    %c0_51 = arith.constant 0 : index
    %c0_52 = arith.constant 0 : index
    %67 = vector.load %arg9[%c0_51, %c0_52] : memref<256x32xf32, #tpu.memory_space<vmem>>, vector<256x32xf32>
    tpu.vector_store %arg9[%c0_51, %c0_52], %66 {strides = array<i32>} : memref<256x32xf32, #tpu.memory_space<vmem>>, vector<256x32xf32>,
    %c0_53 = arith.constant 0 : index
    %c0_54 = arith.constant 0 : index
    %68 = vector.load %arg6[%c0_53, %c0_54] : memref<32x16xf32, #tpu.memory_space<vmem>>, vector<32x16xf32>
    %cst_55 = arith.constant dense<0.000000e+00> : vector<256x16xf32>
    %69 = tpu.matmul %66, %68, %cst_55 {dimension_numbers = #tpu.dot_dimension_numbers<[1], [0], [0], [1], [0, 0, 1, 1], [], []>} : vector<256x32xf32>, vector<32x16xf32>, vector<256x16xf32> -> vector<256x16xf32>
    %c0_56 = arith.constant 0 : index
    %c0_57 = arith.constant 0 : index
    %70 = vector.load %arg7[%c0_56, %c0_57] : memref<1x16xf32, #tpu.memory_space<vmem>>, vector<1x16xf32>
    %71 = vector.broadcast %70 : vector<1x16xf32> to vector<256x16xf32>
    %72 = arith.addf %69, %71 : vector<256x16xf32>
    %cst_58 = arith.constant 0.000000e+00 : f32
    %73 = vector.broadcast %cst_58 : f32 to vector<256x16xf32>
    %74 = arith.maximumf %72, %73 : vector<256x16xf32>
    %c0_59 = arith.constant 0 : index
    %c0_60 = arith.constant 0 : index
    %75 = vector.load %arg8[%c0_59, %c0_60] : memref<256x16xf32, #tpu.memory_space<vmem>>, vector<256x16xf32>
    tpu.vector_store %arg8[%c0_59, %c0_60], %74 {strides = array<i32>} : memref<256x16xf32, #tpu.memory_space<vmem>>, vector<256x16xf32>,
    return
  }
  func.func @transform_0(%arg0: i32) -> (i32, i32) {
    %c0_i32 = arith.constant 0 : i32
    %c0_i32_0 = arith.constant 0 : i32
    return %arg0, %c0_i32 : i32, i32
  }
  func.func @transform_1(%arg0: i32) -> (i32, i32) {
    %c0_i32 = arith.constant 0 : i32
    %c0_i32_0 = arith.constant 0 : i32
    %c0_i32_1 = arith.constant 0 : i32
    return %c0_i32, %c0_i32_0 : i32, i32
  }
  func.func @transform_2(%arg0: i32) -> (i32, i32) {
    %c0_i32 = arith.constant 0 : i32
    %c0_i32_0 = arith.constant 0 : i32
    %c0_i32_1 = arith.constant 0 : i32
    return %c0_i32, %c0_i32_0 : i32, i32
  }
  func.func @transform_3(%arg0: i32) -> (i32, i32, i32) {
    %c0_i32 = arith.constant 0 : i32
    %c0_i32_0 = arith.constant 0 : i32
    %c0_i32_1 = arith.constant 0 : i32
    %c0_i32_2 = arith.constant 0 : i32
    return %c0_i32, %c0_i32_0, %c0_i32_1 : i32, i32, i32
  }
  func.func @transform_4(%arg0: i32) -> (i32, i32) {
    %c0_i32 = arith.constant 0 : i32
    %c0_i32_0 = arith.constant 0 : i32
    %c0_i32_1 = arith.constant 0 : i32
    return %c0_i32, %c0_i32_0 : i32, i32
  }
  func.func @transform_5(%arg0: i32) -> (i32, i32) {
    %c0_i32 = arith.constant 0 : i32
    %c0_i32_0 = arith.constant 0 : i32
    %c0_i32_1 = arith.constant 0 : i32
    return %c0_i32, %c0_i32_0 : i32, i32
  }
  func.func @transform_6(%arg0: i32) -> (i32, i32) {
    %c0_i32 = arith.constant 0 : i32
    %c0_i32_0 = arith.constant 0 : i32
    %c0_i32_1 = arith.constant 0 : i32
    return %c0_i32, %c0_i32_0 : i32, i32
  }
  func.func @transform_7(%arg0: i32) -> (i32, i32) {
    %c0_i32 = arith.constant 0 : i32
    %c0_i32_0 = arith.constant 0 : i32
    return %arg0, %c0_i32 : i32, i32
  }
  func.func @transform_8(%arg0: i32) -> (i32, i32) {
    %c0_i32 = arith.constant 0 : i32
    %c0_i32_0 = arith.constant 0 : i32
    return %arg0, %c0_i32 : i32, i32
  }
}

</mosaic_0001>

<bundles_post_ra>
// kernel: tpu_custom_call.1
= control target key start
LH: loop header
LB: loop body
LE: loop exit
PB: predicated region body
PF: predicated region fallthrough
CT: control target
= control target key end

     0   :  { %vm66_vm0 = vcmask 64512   ;;  %vm429_vm1 = vcmask 261120   ;;  %vm3615_vm2 = vcmask 130048   ;;  %s6224_s1 = inlined_call_operand.vmem [shape: f32[8,32], index: 1, kind: input, shape index: {}]   ;;  %s6225_s0 = inlined_call_operand.vmem [shape: f32[256,8], index: 0, kind: input, shape index: {}]   ;;  %s6226_s3 = inlined_call_operand.vmem [shape: f32[7,32,32], index: 3, kind: input, shape index: {}]   ;;  %s6227_s4 = inlined_call_operand.vmem [shape: f32[8,32], index: 4, kind: input, shape index: {}]   ;;  %s6228_s2 = inlined_call_operand.vmem [shape: f32[8,32], index: 2, kind: input, shape index: {}]   ;;  %s6229_s5 = inlined_call_operand.vmem [shape: f32[32,16], index: 5, kind: input, shape index: {}]   ;;  %s6230_s8 = inlined_call_operand.vmem [shape: f32[256,32], index: 8, kind: output, shape index: {1}]   ;;  %s6231_s6 = inlined_call_operand.vmem [shape: f32[1,16], index: 6, kind: input, shape index: {}]   ;;  %s6232_s7 = inlined_call_operand.vmem [shape: f32[256,16], index: 7, kind: output, shape index: {0}]  }
   0x1   :  { %v60_v0 = vld [vmem:[%s6224_s1] sm:$0xff]  ;;  %v29_v2 = vld [vmem:[%s6225_s0 + $0x8] sm:$0xff]  ;;  %v30_v3 = vld [vmem:[%s6225_s0 + $0x10] sm:$0xff] }
   0x2   :  { %v28_v1 = vld [vmem:[%s6225_s0] sm:$0xff]  ;;  %4363 = vmatprep.subr.mxu0 %v60_v0  ;;  %v31_v4 = vld [vmem:[%s6225_s0 + $0x18] sm:$0xff]  ;;  %v33_v6 = vld [vmem:[%s6225_s0 + $0x28] sm:$0xff] }
   0x3   :  { %4365 = vmatprep.mubr.msk.f32.mxu0 %vm66_vm0, %v28_v1  ;;  %4364 = vmatpush3.msra.mxu0 %v60_v0  ;;  %v32_v5 = vld [vmem:[%s6225_s0 + $0x20] sm:$0xff]  ;;  %v34_v7 = vld [vmem:[%s6225_s0 + $0x30] sm:$0xff]  ;;  %v35_v8 = vld [vmem:[%s6225_s0 + $0x38] sm:$0xff] }
   0x4   :  { %4366 = vmatmul.mubr.msk.f32.vlgmr.msra.gmra.mxu0 %vm66_vm0, %v29_v2  ;;  %v36_v9 = vld [vmem:[%s6225_s0 + $0x40] sm:$0xff]  ;;  %v37_v10 = vld [vmem:[%s6225_s0 + $0x48] sm:$0xff]  ;;  %v38_v11 = vld [vmem:[%s6225_s0 + $0x50] sm:$0xff] }
   0x5   :  { %4368 = vmatprep.mubr.msk.f32.mxu0 %vm66_vm0, %v30_v3  ;;  %v39_v12 = vld [vmem:[%s6225_s0 + $0x58] sm:$0xff]  ;;  %v40_v13 = vld [vmem:[%s6225_s0 + $0x60] sm:$0xff]  ;;  %v41_v14 = vld [vmem:[%s6225_s0 + $0x68] sm:$0xff] }
   0x6   :  { %v42_v15 = vld [vmem:[%s6225_s0 + $0x70] sm:$0xff]  ;;  %v43_v16 = vld [vmem:[%s6225_s0 + $0x78] sm:$0xff]  ;;  %v44_v17 = vld [vmem:[%s6225_s0 + $0x80] sm:$0xff] }
   0x7   :  { %v45_v18 = vld [vmem:[%s6225_s0 + $0x88] sm:$0xff]  ;;  %v46_v19 = vld [vmem:[%s6225_s0 + $0x90] sm:$0xff]  ;;  %v47_v20 = vld [vmem:[%s6225_s0 + $0x98] sm:$0xff] }
   0x8   :  { %4369 = vmatmul.mubr.msk.f32.gmra.mxu0 %vm66_vm0, %v31_v4  ;;  %v48_v21 = vld [vmem:[%s6225_s0 + $0xa0] sm:$0xff]  ;;  %v49_v22 = vld [vmem:[%s6225_s0 + $0xa8] sm:$0xff]  ;;  %v50_v23 = vld [vmem:[%s6225_s0 + $0xb0] sm:$0xff] }
   0x9   :  { %4371 = vmatprep.mubr.msk.f32.mxu0 %vm66_vm0, %v32_v5  ;;  %v51_v24 = vld [vmem:[%s6225_s0 + $0xb8] sm:$0xff]  ;;  %v52_v25 = vld [vmem:[%s6225_s0 + $0xc0] sm:$0xff]  ;;  %v53_v26 = vld [vmem:[%s6225_s0 + $0xc8] sm:$0xff] }
   0xa   :  { %v54_v27 = vld [vmem:[%s6225_s0 + $0xd0] sm:$0xff]  ;;  %v55_v28 = vld [vmem:[%s6225_s0 + $0xd8] sm:$0xff]  ;;  %v56_v29 = vld [vmem:[%s6225_s0 + $0xe0] sm:$0xff] }
   0xb   :  { %v57_v30 = vld [vmem:[%s6225_s0 + $0xe8] sm:$0xff]  ;;  %v58_v31 = vld [vmem:[%s6225_s0 + $0xf0] sm:$0xff]  ;;  %v59_v32 = vld [vmem:[%s6225_s0 + $0xf8] sm:$0xff] }
   0xc   :  { %4372 = vmatmul.mubr.msk.f32.gmra.mxu0 %vm66_vm0, %v33_v6  ;;  %v423_v33 = vld [vmem:[%s6226_s3 + $0x18] sm:$0xff]  ;;  %v422_v34 = vld [vmem:[%s6226_s3 + $0x10] sm:$0xff]  ;;  %v421_v35 = vld [vmem:[%s6226_s3 + $0x8] sm:$0xff] }
   0xd   :  { %4374 = vmatprep.mubr.msk.f32.mxu0 %vm66_vm0, %v34_v7  ;;  %4413 = vmatprep.subr.mxu1 %v423_v33  ;;  %v420_v36 = vld [vmem:[%s6226_s3] sm:$0xff]  ;;  %v3725_v37 = vld [vmem:[%s6226_s3 + $0x38] sm:$0xff]  ;;  %v3724_v38 = vld [vmem:[%s6226_s3 + $0x30] sm:$0xff] }
   0xe   :  { %4414 = vmatpush3.msra.mxu1 %v423_v33  ;;  %4469 = vmatprep.subr.mxu0 %v3725_v37  ;;  %v3723_v39 = vld [vmem:[%s6226_s3 + $0x28] sm:$0xff]  ;;  %v3722_v40 = vld [vmem:[%s6226_s3 + $0x20] sm:$0xff] }
   0xf   :  { %4415 = vmatprep.subr.mxu1 %v422_v34  ;;  %4470 = vmatpush3.msra.mxu0 %v3725_v37  ;;  %v5146_v41 = vld [vmem:[%s6227_s4] ss:$0 sm:$0xff] }
  0x10   :  { %4375 = vmatmul.mubr.msk.f32.gmra.mxu0 %vm66_vm0, %v35_v8  ;;  %4416 = vmatpush3.msra.mxu1 %v422_v34 }
  0x11   :  { %4377 = vmatprep.mubr.msk.f32.mxu0 %vm66_vm0, %v36_v9  ;;  %4417 = vmatprep.subr.mxu1 %v421_v35 }
  0x12   :  { %4418 = vmatpush3.msra.mxu1 %v421_v35  ;;  %4471 = vmatprep.subr.mxu0 %v3724_v38 }
  0x13   :  { %4419 = vmatprep.subr.mxu1 %v420_v36  ;;  %4472 = vmatpush3.msra.mxu0 %v3724_v38 }
  0x14   :  { %4378 = vmatmul.mubr.msk.f32.gmra.mxu0 %vm66_vm0, %v37_v10  ;;  %4420 = vmatpush3.msra.mxu1 %v420_v36 }
  0x15   :  { %4380 = vmatprep.mubr.msk.f32.mxu0 %vm66_vm0, %v38_v11  ;;  %4473 = vmatprep.subr.mxu0 %v3723_v39 }
  0x16   :  { %4474 = vmatpush3.msra.mxu0 %v3723_v39 }
  0x17   :  { %4475 = vmatprep.subr.mxu0 %v3722_v40 }
  0x18   :  { %4381 = vmatmul.mubr.msk.f32.gmra.mxu0 %vm66_vm0, %v39_v12 }
  0x19   :  { %4383 = vmatprep.mubr.msk.f32.mxu0 %vm66_vm0, %v40_v13  ;;  %4476 = vmatpush3.msra.mxu0 %v3722_v40 }
  0x1c   :  { %4384 = vmatmul.mubr.msk.f32.gmra.mxu0 %vm66_vm0, %v41_v14 }
  0x1d   :  { %4386 = vmatprep.mubr.msk.f32.mxu0 %vm66_vm0, %v42_v15 }
  0x20   :  { %4387 = vmatmul.mubr.msk.f32.gmra.mxu0 %vm66_vm0, %v43_v16 }
  0x21   :  { %4389 = vmatprep.mubr.msk.f32.mxu0 %vm66_vm0, %v44_v17 }
  0x24   :  { %4390 = vmatmul.mubr.msk.f32.gmra.mxu0 %vm66_vm0, %v45_v18 }
  0x25   :  { %4392 = vmatprep.mubr.msk.f32.mxu0 %vm66_vm0, %v46_v19 }
  0x28   :  { %4393 = vmatmul.mubr.msk.f32.gmra.mxu0 %vm66_vm0, %v47_v20 }
  0x29   :  { %4395 = vmatprep.mubr.msk.f32.mxu0 %vm66_vm0, %v48_v21 }
  0x2c   :  { %4396 = vmatmul.mubr.msk.f32.gmra.mxu0 %vm66_vm0, %v49_v22 }
  0x2d   :  { %4398 = vmatprep.mubr.msk.f32.mxu0 %vm66_vm0, %v50_v23 }
  0x30   :  { %4399 = vmatmul.mubr.msk.f32.gmra.mxu0 %vm66_vm0, %v51_v24 }
  0x31   :  { %4401 = vmatprep.mubr.msk.f32.mxu0 %vm66_vm0, %v52_v25 }
  0x34   :  { %4402 = vmatmul.mubr.msk.f32.gmra.mxu0 %vm66_vm0, %v53_v26 }
  0x35   :  { %4404 = vmatprep.mubr.msk.f32.mxu0 %vm66_vm0, %v54_v27 }
  0x38   :  { %4405 = vmatmul.mubr.msk.f32.gmra.mxu0 %vm66_vm0, %v55_v28 }
  0x39   :  { %4407 = vmatprep.mubr.msk.f32.mxu0 %vm66_vm0, %v56_v29 }
  0x3c   :  { %4408 = vmatmul.mubr.msk.f32.gmra.mxu0 %vm66_vm0, %v57_v30 }
  0x3d   :  { %4410 = vmatprep.mubr.msk.f32.mxu0 %vm66_vm0, %v58_v31 }
  0x40   :  { %4411 = vmatmul.mubr.msk.f32.gmra.mxu0 %vm66_vm0, %v59_v32 }
  0xc4   :  { %v4367_v42 = vpop.f32.mrf.mxu0 }
  0xc5   :  { %v235_v43 = vadd.f32 %v4367_v42, %v5146_v41 }
  0xc6   :  { %v229_v44 = vpop.f32.mrf.mxu0 }
  0xc7   :  { %v230_v45 = vadd.f32 %v5146_v41, %v229_v44  ;;  %v389_v48 = vmax.f32 %v235_v43, 0.0 }
  0xc8   :  { %v4370_v46 = vpop.f32.mrf.mxu0 }
  0xc9   :  { %v388_v47 = vmax.f32 %v230_v45, 0.0  ;;  %v245_v49 = vadd.f32 %v4370_v46, %v5146_v41 }
  0xca   :  { %v239_v50 = vpop.f32.mrf.mxu0 }
  0xcb   :  { %v240_v51 = vadd.f32 %v5146_v41, %v239_v50  ;;  %4421 = vmatprep.mubr.msk.f32.mxu1 %vm429_vm1, %v388_v47  ;;  %v391_v54 = vmax.f32 %v245_v49, 0.0 }
  0xcc   :  { %v4373_v52 = vpop.f32.mrf.mxu0  ;;  %4422 = vmatmul.mubr.msk.f32.vlgmr.msra.gmra.mxu1 %vm429_vm1, %v389_v48 }
  0xcd   :  { %v390_v53 = vmax.f32 %v240_v51, 0.0  ;;  %v255_v55 = vadd.f32 %v4373_v52, %v5146_v41 }
  0xce   :  { %v249_v56 = vpop.f32.mrf.mxu0 }
  0xcf   :  { %v250_v57 = vadd.f32 %v5146_v41, %v249_v56  ;;  %4424 = vmatprep.mubr.msk.f32.mxu1 %vm429_vm1, %v390_v53  ;;  %v393_v60 = vmax.f32 %v255_v55, 0.0 }
  0xd0   :  { %v4376_v58 = vpop.f32.mrf.mxu0  ;;  %4425 = vmatmul.mubr.msk.f32.gmra.mxu1 %vm429_vm1, %v391_v54 }
  0xd1   :  { %v392_v59 = vmax.f32 %v250_v57, 0.0  ;;  %v265_v61 = vadd.f32 %v4376_v58, %v5146_v41 }
  0xd2   :  { %v259_v62 = vpop.f32.mrf.mxu0 }
  0xd3   :  { %v260_v63 = vadd.f32 %v5146_v41, %v259_v62  ;;  %4427 = vmatprep.mubr.msk.f32.mxu1 %vm429_vm1, %v392_v59  ;;  %v395_v2 = vmax.f32 %v265_v61, 0.0 }
  0xd4   :  { %v4379_v0 = vpop.f32.mrf.mxu0  ;;  %4428 = vmatmul.mubr.msk.f32.gmra.mxu1 %vm429_vm1, %v393_v60 }
  0xd5   :  { %v394_v1 = vmax.f32 %v260_v63, 0.0  ;;  %v275_v3 = vadd.f32 %v4379_v0, %v5146_v41 }
  0xd6   :  { %v269_v4 = vpop.f32.mrf.mxu0 }
  0xd7   :  { %v270_v5 = vadd.f32 %v5146_v41, %v269_v4  ;;  %4430 = vmatprep.mubr.msk.f32.mxu1 %vm429_vm1, %v394_v1  ;;  %v397_v8 = vmax.f32 %v275_v3, 0.0 }
  0xd8   :  { %v4382_v6 = vpop.f32.mrf.mxu0  ;;  %4431 = vmatmul.mubr.msk.f32.gmra.mxu1 %vm429_vm1, %v395_v2 }
  0xd9   :  { %v396_v7 = vmax.f32 %v270_v5, 0.0  ;;  %v285_v9 = vadd.f32 %v4382_v6, %v5146_v41 }
  0xda   :  { %v279_v10 = vpop.f32.mrf.mxu0 }
  0xdb   :  { %v280_v11 = vadd.f32 %v5146_v41, %v279_v10  ;;  %4433 = vmatprep.mubr.msk.f32.mxu1 %vm429_vm1, %v396_v7  ;;  %v399_v14 = vmax.f32 %v285_v9, 0.0 }
  0xdc   :  { %v4385_v12 = vpop.f32.mrf.mxu0  ;;  %4434 = vmatmul.mubr.msk.f32.gmra.mxu1 %vm429_vm1, %v397_v8 }
  0xdd   :  { %v398_v13 = vmax.f32 %v280_v11, 0.0  ;;  %v295_v15 = vadd.f32 %v4385_v12, %v5146_v41  ;;  %v3762_v11 = vld [vmem:[%s6226_s3 + $0x58] sm:$0xff]  ;;  %v3761_v12 = vld [vmem:[%s6226_s3 + $0x50] sm:$0xff] }
  0xde   :  { %v289_v16 = vpop.f32.mrf.mxu0  ;;  %4525 = vmatprep.subr.mxu1 %v3762_v11 }
  0xdf   :  { %v290_v17 = vadd.f32 %v5146_v41, %v289_v16  ;;  %4436 = vmatprep.mubr.msk.f32.mxu1 %vm429_vm1, %v398_v13  ;;  %v401_v20 = vmax.f32 %v295_v15, 0.0  ;;  %4526 = vmatpush3.msra.mxu1 %v3762_v11  ;;  %v3759_v13 = vld [vmem:[%s6226_s3 + $0x40] sm:$0xff] }
  0xe0   :  { %v4388_v18 = vpop.f32.mrf.mxu0  ;;  %4437 = vmatmul.mubr.msk.f32.gmra.mxu1 %vm429_vm1, %v399_v14  ;;  %4527 = vmatprep.subr.mxu1 %v3761_v12  ;;  %v5227_v14 = vld [vmem:[%s6227_s4 + $0x1] ss:$0 sm:$0xff] }
  0xe1   :  { %v400_v19 = vmax.f32 %v290_v17, 0.0  ;;  %v305_v21 = vadd.f32 %v4388_v18, %v5146_v41  ;;  %4528 = vmatpush3.msra.mxu1 %v3761_v12 }
  0xe2   :  { %v299_v22 = vpop.f32.mrf.mxu0 }
  0xe3   :  { %v300_v23 = vadd.f32 %v5146_v41, %v299_v22  ;;  %4439 = vmatprep.mubr.msk.f32.mxu1 %vm429_vm1, %v400_v19  ;;  %v403_v26 = vmax.f32 %v305_v21, 0.0 }
  0xe4   :  { %v4391_v24 = vpop.f32.mrf.mxu0  ;;  %4440 = vmatmul.mubr.msk.f32.gmra.mxu1 %vm429_vm1, %v401_v20 }
  0xe5   :  { %v402_v25 = vmax.f32 %v300_v23, 0.0  ;;  %v315_v27 = vadd.f32 %v4391_v24, %v5146_v41 }
  0xe6   :  { %v309_v28 = vpop.f32.mrf.mxu0 }
  0xe7   :  { %v310_v29 = vadd.f32 %v5146_v41, %v309_v28  ;;  %4442 = vmatprep.mubr.msk.f32.mxu1 %vm429_vm1, %v402_v25  ;;  %v405_v32 = vmax.f32 %v315_v27, 0.0 }
  0xe8   :  { %v4394_v30 = vpop.f32.mrf.mxu0  ;;  %4443 = vmatmul.mubr.msk.f32.gmra.mxu1 %vm429_vm1, %v403_v26 }
  0xe9   :  { %v404_v31 = vmax.f32 %v310_v29, 0.0  ;;  %v325_v33 = vadd.f32 %v4394_v30, %v5146_v41 }
  0xea   :  { %v319_v34 = vpop.f32.mrf.mxu0 }
  0xeb   :  { %v320_v35 = vadd.f32 %v5146_v41, %v319_v34  ;;  %4445 = vmatprep.mubr.msk.f32.mxu1 %vm429_vm1, %v404_v31  ;;  %v407_v38 = vmax.f32 %v325_v33, 0.0 }
  0xec   :  { %v4397_v36 = vpop.f32.mrf.mxu0  ;;  %4446 = vmatmul.mubr.msk.f32.gmra.mxu1 %vm429_vm1, %v405_v32 }
  0xed   :  { %v406_v37 = vmax.f32 %v320_v35, 0.0  ;;  %v335_v39 = vadd.f32 %v4397_v36, %v5146_v41 }
  0xee   :  { %v329_v40 = vpop.f32.mrf.mxu0 }
  0xef   :  { %v330_v42 = vadd.f32 %v5146_v41, %v329_v40  ;;  %4448 = vmatprep.mubr.msk.f32.mxu1 %vm429_vm1, %v406_v37  ;;  %v409_v45 = vmax.f32 %v335_v39, 0.0 }
  0xf0   :  { %v4400_v43 = vpop.f32.mrf.mxu0  ;;  %4449 = vmatmul.mubr.msk.f32.gmra.mxu1 %vm429_vm1, %v407_v38 }
  0xf1   :  { %v408_v44 = vmax.f32 %v330_v42, 0.0  ;;  %v345_v46 = vadd.f32 %v4400_v43, %v5146_v41 }
  0xf2   :  { %v339_v47 = vpop.f32.mrf.mxu0 }
  0xf3   :  { %v340_v48 = vadd.f32 %v5146_v41, %v339_v47  ;;  %4451 = vmatprep.mubr.msk.f32.mxu1 %vm429_vm1, %v408_v44  ;;  %v411_v51 = vmax.f32 %v345_v46, 0.0 }
  0xf4   :  { %v4403_v49 = vpop.f32.mrf.mxu0  ;;  %4452 = vmatmul.mubr.msk.f32.gmra.mxu1 %vm429_vm1, %v409_v45 }
  0xf5   :  { %v410_v50 = vmax.f32 %v340_v48, 0.0  ;;  %v355_v52 = vadd.f32 %v4403_v49, %v5146_v41 }
  0xf6   :  { %v349_v53 = vpop.f32.mrf.mxu0 }
  0xf7   :  { %v350_v54 = vadd.f32 %v5146_v41, %v349_v53  ;;  %4454 = vmatprep.mubr.msk.f32.mxu1 %vm429_vm1, %v410_v50  ;;  %v413_v57 = vmax.f32 %v355_v52, 0.0 }
  0xf8   :  { %v4406_v55 = vpop.f32.mrf.mxu0  ;;  %4455 = vmatmul.mubr.msk.f32.gmra.mxu1 %vm429_vm1, %v411_v51 }
  0xf9   :  { %v412_v56 = vmax.f32 %v350_v54, 0.0  ;;  %v365_v58 = vadd.f32 %v4406_v55, %v5146_v41 }
  0xfa   :  { %v359_v59 = vpop.f32.mrf.mxu0 }
  0xfb   :  { %v360_v60 = vadd.f32 %v5146_v41, %v359_v59  ;;  %4457 = vmatprep.mubr.msk.f32.mxu1 %vm429_vm1, %v412_v56  ;;  %v415_v63 = vmax.f32 %v365_v58, 0.0 }
  0xfc   :  { %v4409_v61 = vpop.f32.mrf.mxu0  ;;  %4458 = vmatmul.mubr.msk.f32.gmra.mxu1 %vm429_vm1, %v413_v57 }
  0xfd   :  { %v414_v62 = vmax.f32 %v360_v60, 0.0  ;;  %v375_v0 = vadd.f32 %v4409_v61, %v5146_v41 }
  0xfe   :  { %v369_v1 = vpop.f32.mrf.mxu0 }
  0xff   :  { %v370_v2 = vadd.f32 %v5146_v41, %v369_v1  ;;  %4460 = vmatprep.mubr.msk.f32.mxu1 %vm429_vm1, %v414_v62  ;;  %v417_v5 = vmax.f32 %v375_v0, 0.0 }
 0x100   :  { %v4412_v3 = vpop.f32.mrf.mxu0  ;;  %4461 = vmatmul.mubr.msk.f32.gmra.mxu1 %vm429_vm1, %v415_v63 }
 0x101   :  { %v416_v4 = vmax.f32 %v370_v2, 0.0  ;;  %v385_v6 = vadd.f32 %v4412_v3, %v5146_v41 }
 0x102   :  { %v379_v7 = vpop.f32.mrf.mxu0 }
 0x103   :  { %v380_v8 = vadd.f32 %v5146_v41, %v379_v7  ;;  %4463 = vmatprep.mubr.msk.f32.mxu1 %vm429_vm1, %v416_v4  ;;  %v419_v10 = vmax.f32 %v385_v6, 0.0  ;;  %v3760_v41 = vld [vmem:[%s6226_s3 + $0x48] sm:$0xff] }
 0x104   :  { %4464 = vmatmul.mubr.msk.f32.gmra.mxu1 %vm429_vm1, %v417_v5  ;;  %4529 = vmatprep.subr.mxu1 %v3760_v41 }
 0x105   :  { %v418_v9 = vmax.f32 %v380_v8, 0.0  ;;  %4530 = vmatpush3.msra.mxu1 %v3760_v41 }
 0x106   :  { %4531 = vmatprep.subr.mxu1 %v3759_v13 }
 0x107   :  { %4466 = vmatprep.mubr.msk.f32.mxu1 %vm429_vm1, %v418_v9  ;;  %4532 = vmatpush3.msra.mxu1 %v3759_v13 }
 0x108   :  { %4467 = vmatmul.mubr.msk.f32.gmra.mxu1 %vm429_vm1, %v419_v10 }
 0x18c   :  { %v4423_v15 = vpop.f32.mrf.mxu1 }
 0x18d   :  { %v598_v16 = vadd.f32 %v4423_v15, %v5227_v14 }
 0x18e   :  { %v592_v17 = vpop.f32.mrf.mxu1 }
 0x18f   :  { %v593_v18 = vadd.f32 %v5227_v14, %v592_v17  ;;  %v752_v21 = vmax.f32 %v598_v16, 0.0 }
 0x190   :  { %v4426_v19 = vpop.f32.mrf.mxu1 }
 0x191   :  { %v751_v20 = vmax.f32 %v593_v18, 0.0  ;;  %v608_v22 = vadd.f32 %v4426_v19, %v5227_v14 }
 0x192   :  { %v602_v23 = vpop.f32.mrf.mxu1 }
 0x193   :  { %v603_v24 = vadd.f32 %v5227_v14, %v602_v23  ;;  %4477 = vmatprep.mubr.msk.f32.mxu0 %vm429_vm1, %v751_v20  ;;  %v754_v27 = vmax.f32 %v608_v22, 0.0 }
 0x194   :  { %v4429_v25 = vpop.f32.mrf.mxu1  ;;  %4478 = vmatmul.mubr.msk.f32.vlgmr.msra.gmra.mxu0 %vm429_vm1, %v752_v21 }
 0x195   :  { %v753_v26 = vmax.f32 %v603_v24, 0.0  ;;  %v618_v28 = vadd.f32 %v4429_v25, %v5227_v14 }
 0x196   :  { %v612_v29 = vpop.f32.mrf.mxu1 }
 0x197   :  { %v613_v30 = vadd.f32 %v5227_v14, %v612_v29  ;;  %4480 = vmatprep.mubr.msk.f32.mxu0 %vm429_vm1, %v753_v26  ;;  %v756_v33 = vmax.f32 %v618_v28, 0.0 }
 0x198   :  { %v4432_v31 = vpop.f32.mrf.mxu1  ;;  %4481 = vmatmul.mubr.msk.f32.gmra.mxu0 %vm429_vm1, %v754_v27 }
 0x199   :  { %v755_v32 = vmax.f32 %v613_v30, 0.0  ;;  %v628_v34 = vadd.f32 %v4432_v31, %v5227_v14 }
 0x19a   :  { %v622_v35 = vpop.f32.mrf.mxu1 }
 0x19b   :  { %v623_v36 = vadd.f32 %v5227_v14, %v622_v35  ;;  %4483 = vmatprep.mubr.msk.f32.mxu0 %vm429_vm1, %v755_v32  ;;  %v758_v39 = vmax.f32 %v628_v34, 0.0 }
 0x19c   :  { %v4435_v37 = vpop.f32.mrf.mxu1  ;;  %4484 = vmatmul.mubr.msk.f32.gmra.mxu0 %vm429_vm1, %v756_v33 }
 0x19d   :  { %v757_v38 = vmax.f32 %v623_v36, 0.0  ;;  %v638_v40 = vadd.f32 %v4435_v37, %v5227_v14 }
 0x19e   :  { %v632_v42 = vpop.f32.mrf.mxu1 }
 0x19f   :  { %v633_v43 = vadd.f32 %v5227_v14, %v632_v42  ;;  %4486 = vmatprep.mubr.msk.f32.mxu0 %vm429_vm1, %v757_v38  ;;  %v760_v46 = vmax.f32 %v638_v40, 0.0 }
 0x1a0   :  { %v4438_v44 = vpop.f32.mrf.mxu1  ;;  %4487 = vmatmul.mubr.msk.f32.gmra.mxu0 %vm429_vm1, %v758_v39 }
 0x1a1   :  { %v759_v45 = vmax.f32 %v633_v43, 0.0  ;;  %v648_v47 = vadd.f32 %v4438_v44, %v5227_v14 }
 0x1a2   :  { %v642_v48 = vpop.f32.mrf.mxu1 }
 0x1a3   :  { %v643_v49 = vadd.f32 %v5227_v14, %v642_v48  ;;  %4489 = vmatprep.mubr.msk.f32.mxu0 %vm429_vm1, %v759_v45  ;;  %v762_v52 = vmax.f32 %v648_v47, 0.0 }
 0x1a4   :  { %v4441_v50 = vpop.f32.mrf.mxu1  ;;  %4490 = vmatmul.mubr.msk.f32.gmra.mxu0 %vm429_vm1, %v760_v46 }
 0x1a5   :  { %v761_v51 = vmax.f32 %v643_v49, 0.0  ;;  %v658_v53 = vadd.f32 %v4441_v50, %v5227_v14  ;;  %v3799_v49 = vld [vmem:[%s6226_s3 + $0x78] sm:$0xff]  ;;  %v3798_v50 = vld [vmem:[%s6226_s3 + $0x70] sm:$0xff] }
 0x1a6   :  { %v652_v54 = vpop.f32.mrf.mxu1  ;;  %4581 = vmatprep.subr.mxu0 %v3799_v49 }
 0x1a7   :  { %v653_v55 = vadd.f32 %v5227_v14, %v652_v54  ;;  %4492 = vmatprep.mubr.msk.f32.mxu0 %vm429_vm1, %v761_v51  ;;  %v764_v58 = vmax.f32 %v658_v53, 0.0  ;;  %4582 = vmatpush3.msra.mxu0 %v3799_v49  ;;  %v3796_v51 = vld [vmem:[%s6226_s3 + $0x60] sm:$0xff] }
 0x1a8   :  { %v4444_v56 = vpop.f32.mrf.mxu1  ;;  %4493 = vmatmul.mubr.msk.f32.gmra.mxu0 %vm429_vm1, %v762_v52  ;;  %4583 = vmatprep.subr.mxu0 %v3798_v50  ;;  %v5308_v52 = vld [vmem:[%s6227_s4 + $0x2] ss:$0 sm:$0xff] }
 0x1a9   :  { %v763_v57 = vmax.f32 %v653_v55, 0.0  ;;  %v668_v59 = vadd.f32 %v4444_v56, %v5227_v14  ;;  %4584 = vmatpush3.msra.mxu0 %v3798_v50 }
 0x1aa   :  { %v662_v60 = vpop.f32.mrf.mxu1 }
 0x1ab   :  { %v663_v61 = vadd.f32 %v5227_v14, %v662_v60  ;;  %4495 = vmatprep.mubr.msk.f32.mxu0 %vm429_vm1, %v763_v57  ;;  %v766_v0 = vmax.f32 %v668_v59, 0.0 }
 0x1ac   :  { %v4447_v62 = vpop.f32.mrf.mxu1  ;;  %4496 = vmatmul.mubr.msk.f32.gmra.mxu0 %vm429_vm1, %v764_v58 }
 0x1ad   :  { %v765_v63 = vmax.f32 %v663_v61, 0.0  ;;  %v678_v1 = vadd.f32 %v4447_v62, %v5227_v14 }
 0x1ae   :  { %v672_v2 = vpop.f32.mrf.mxu1 }
 0x1af   :  { %v673_v3 = vadd.f32 %v5227_v14, %v672_v2  ;;  %4498 = vmatprep.mubr.msk.f32.mxu0 %vm429_vm1, %v765_v63  ;;  %v768_v6 = vmax.f32 %v678_v1, 0.0 }
 0x1b0   :  { %v4450_v4 = vpop.f32.mrf.mxu1  ;;  %4499 = vmatmul.mubr.msk.f32.gmra.mxu0 %vm429_vm1, %v766_v0 }
 0x1b1   :  { %v767_v5 = vmax.f32 %v673_v3, 0.0  ;;  %v688_v7 = vadd.f32 %v4450_v4, %v5227_v14 }
 0x1b2   :  { %v682_v8 = vpop.f32.mrf.mxu1 }
 0x1b3   :  { %v683_v9 = vadd.f32 %v5227_v14, %v682_v8  ;;  %4501 = vmatprep.mubr.msk.f32.mxu0 %vm429_vm1, %v767_v5  ;;  %v770_v12 = vmax.f32 %v688_v7, 0.0 }
 0x1b4   :  { %v4453_v10 = vpop.f32.mrf.mxu1  ;;  %4502 = vmatmul.mubr.msk.f32.gmra.mxu0 %vm429_vm1, %v768_v6 }
 0x1b5   :  { %v769_v11 = vmax.f32 %v683_v9, 0.0  ;;  %v698_v41 = vadd.f32 %v4453_v10, %v5227_v14 }
 0x1b6   :  { %v692_v13 = vpop.f32.mrf.mxu1 }
 0x1b7   :  { %v693_v15 = vadd.f32 %v5227_v14, %v692_v13  ;;  %4504 = vmatprep.mubr.msk.f32.mxu0 %vm429_vm1, %v769_v11  ;;  %v772_v18 = vmax.f32 %v698_v41, 0.0 }
 0x1b8   :  { %v4456_v16 = vpop.f32.mrf.mxu1  ;;  %4505 = vmatmul.mubr.msk.f32.gmra.mxu0 %vm429_vm1, %v770_v12 }
 0x1b9   :  { %v771_v17 = vmax.f32 %v693_v15, 0.0  ;;  %v708_v19 = vadd.f32 %v4456_v16, %v5227_v14 }
 0x1ba   :  { %v702_v20 = vpop.f32.mrf.mxu1 }
 0x1bb   :  { %v703_v21 = vadd.f32 %v5227_v14, %v702_v20  ;;  %4507 = vmatprep.mubr.msk.f32.mxu0 %vm429_vm1, %v771_v17  ;;  %v774_v24 = vmax.f32 %v708_v19, 0.0 }
 0x1bc   :  { %v4459_v22 = vpop.f32.mrf.mxu1  ;;  %4508 = vmatmul.mubr.msk.f32.gmra.mxu0 %vm429_vm1, %v772_v18 }
 0x1bd   :  { %v773_v23 = vmax.f32 %v703_v21, 0.0  ;;  %v718_v25 = vadd.f32 %v4459_v22, %v5227_v14 }
 0x1be   :  { %v712_v26 = vpop.f32.mrf.mxu1 }
 0x1bf   :  { %v713_v27 = vadd.f32 %v5227_v14, %v712_v26  ;;  %4510 = vmatprep.mubr.msk.f32.mxu0 %vm429_vm1, %v773_v23  ;;  %v776_v30 = vmax.f32 %v718_v25, 0.0 }
 0x1c0   :  { %v4462_v28 = vpop.f32.mrf.mxu1  ;;  %4511 = vmatmul.mubr.msk.f32.gmra.mxu0 %vm429_vm1, %v774_v24 }
 0x1c1   :  { %v775_v29 = vmax.f32 %v713_v27, 0.0  ;;  %v728_v31 = vadd.f32 %v4462_v28, %v5227_v14 }
 0x1c2   :  { %v722_v32 = vpop.f32.mrf.mxu1 }
 0x1c3   :  { %v723_v33 = vadd.f32 %v5227_v14, %v722_v32  ;;  %4513 = vmatprep.mubr.msk.f32.mxu0 %vm429_vm1, %v775_v29  ;;  %v778_v36 = vmax.f32 %v728_v31, 0.0 }
 0x1c4   :  { %v4465_v34 = vpop.f32.mrf.mxu1  ;;  %4514 = vmatmul.mubr.msk.f32.gmra.mxu0 %vm429_vm1, %v776_v30 }
 0x1c5   :  { %v777_v35 = vmax.f32 %v723_v33, 0.0  ;;  %v738_v37 = vadd.f32 %v4465_v34, %v5227_v14 }
 0x1c6   :  { %v732_v38 = vpop.f32.mrf.mxu1 }
 0x1c7   :  { %v733_v39 = vadd.f32 %v5227_v14, %v732_v38  ;;  %4516 = vmatprep.mubr.msk.f32.mxu0 %vm429_vm1, %v777_v35  ;;  %v780_v43 = vmax.f32 %v738_v37, 0.0 }
 0x1c8   :  { %v4468_v40 = vpop.f32.mrf.mxu1  ;;  %4517 = vmatmul.mubr.msk.f32.gmra.mxu0 %vm429_vm1, %v778_v36 }
 0x1c9   :  { %v779_v42 = vmax.f32 %v733_v39, 0.0  ;;  %v748_v44 = vadd.f32 %v4468_v40, %v5227_v14 }
 0x1ca   :  { %v742_v45 = vpop.f32.mrf.mxu1 }
 0x1cb   :  { %v743_v46 = vadd.f32 %v5227_v14, %v742_v45  ;;  %4519 = vmatprep.mubr.msk.f32.mxu0 %vm429_vm1, %v779_v42  ;;  %v782_v48 = vmax.f32 %v748_v44, 0.0  ;;  %v3797_v14 = vld [vmem:[%s6226_s3 + $0x68] sm:$0xff] }
 0x1cc   :  { %4520 = vmatmul.mubr.msk.f32.gmra.mxu0 %vm429_vm1, %v780_v43  ;;  %4585 = vmatprep.subr.mxu0 %v3797_v14 }
 0x1cd   :  { %v781_v47 = vmax.f32 %v743_v46, 0.0  ;;  %4586 = vmatpush3.msra.mxu0 %v3797_v14 }
 0x1ce   :  { %4587 = vmatprep.subr.mxu0 %v3796_v51 }
 0x1cf   :  { %4522 = vmatprep.mubr.msk.f32.mxu0 %vm429_vm1, %v781_v47  ;;  %4588 = vmatpush3.msra.mxu0 %v3796_v51 }
 0x1d0   :  { %4523 = vmatmul.mubr.msk.f32.gmra.mxu0 %vm429_vm1, %v782_v48 }
 0x254   :  { %v4479_v53 = vpop.f32.mrf.mxu0 }
 0x255   :  { %v961_v54 = vadd.f32 %v4479_v53, %v5308_v52 }
 0x256   :  { %v955_v55 = vpop.f32.mrf.mxu0 }
 0x257   :  { %v956_v56 = vadd.f32 %v5308_v52, %v955_v55  ;;  %v1115_v59 = vmax.f32 %v961_v54, 0.0 }
 0x258   :  { %v4482_v57 = vpop.f32.mrf.mxu0 }
 0x259   :  { %v1114_v58 = vmax.f32 %v956_v56, 0.0  ;;  %v971_v60 = vadd.f32 %v4482_v57, %v5308_v52 }
 0x25a   :  { %v965_v61 = vpop.f32.mrf.mxu0 }
 0x25b   :  { %v966_v62 = vadd.f32 %v5308_v52, %v965_v61  ;;  %4533 = vmatprep.mubr.msk.f32.mxu1 %vm429_vm1, %v1114_v58  ;;  %v1117_v1 = vmax.f32 %v971_v60, 0.0 }
 0x25c   :  { %v4485_v63 = vpop.f32.mrf.mxu0  ;;  %4534 = vmatmul.mubr.msk.f32.vlgmr.msra.gmra.mxu1 %vm429_vm1, %v1115_v59 }
 0x25d   :  { %v1116_v0 = vmax.f32 %v966_v62, 0.0  ;;  %v981_v2 = vadd.f32 %v4485_v63, %v5308_v52 }
 0x25e   :  { %v975_v3 = vpop.f32.mrf.mxu0 }
 0x25f   :  { %v976_v4 = vadd.f32 %v5308_v52, %v975_v3  ;;  %4536 = vmatprep.mubr.msk.f32.mxu1 %vm429_vm1, %v1116_v0  ;;  %v1119_v7 = vmax.f32 %v981_v2, 0.0 }
 0x260   :  { %v4488_v5 = vpop.f32.mrf.mxu0  ;;  %4537 = vmatmul.mubr.msk.f32.gmra.mxu1 %vm429_vm1, %v1117_v1 }
 0x261   :  { %v1118_v6 = vmax.f32 %v976_v4, 0.0  ;;  %v991_v8 = vadd.f32 %v4488_v5, %v5308_v52 }
 0x262   :  { %v985_v9 = vpop.f32.mrf.mxu0 }
 0x263   :  { %v986_v10 = vadd.f32 %v5308_v52, %v985_v9  ;;  %4539 = vmatprep.mubr.msk.f32.mxu1 %vm429_vm1, %v1118_v6  ;;  %v1121_v41 = vmax.f32 %v991_v8, 0.0 }
 0x264   :  { %v4491_v11 = vpop.f32.mrf.mxu0  ;;  %4540 = vmatmul.mubr.msk.f32.gmra.mxu1 %vm429_vm1, %v1119_v7 }
 0x265   :  { %v1120_v12 = vmax.f32 %v986_v10, 0.0  ;;  %v1001_v13 = vadd.f32 %v4491_v11, %v5308_v52 }
 0x266   :  { %v995_v15 = vpop.f32.mrf.mxu0 }
 0x267   :  { %v996_v16 = vadd.f32 %v5308_v52, %v995_v15  ;;  %4542 = vmatprep.mubr.msk.f32.mxu1 %vm429_vm1, %v1120_v12  ;;  %v1123_v19 = vmax.f32 %v1001_v13, 0.0 }
 0x268   :  { %v4494_v17 = vpop.f32.mrf.mxu0  ;;  %4543 = vmatmul.mubr.msk.f32.gmra.mxu1 %vm429_vm1, %v1121_v41 }
 0x269   :  { %v1122_v18 = vmax.f32 %v996_v16, 0.0  ;;  %v1011_v20 = vadd.f32 %v4494_v17, %v5308_v52 }
 0x26a   :  { %v1005_v21 = vpop.f32.mrf.mxu0 }
 0x26b   :  { %v1006_v22 = vadd.f32 %v5308_v52, %v1005_v21  ;;  %4545 = vmatprep.mubr.msk.f32.mxu1 %vm429_vm1, %v1122_v18  ;;  %v1125_v25 = vmax.f32 %v1011_v20, 0.0 }
 0x26c   :  { %v4497_v23 = vpop.f32.mrf.mxu0  ;;  %4546 = vmatmul.mubr.msk.f32.gmra.mxu1 %vm429_vm1, %v1123_v19 }
 0x26d   :  { %v1124_v24 = vmax.f32 %v1006_v22, 0.0  ;;  %v1021_v26 = vadd.f32 %v4497_v23, %v5308_v52  ;;  %v3836_v22 = vld [vmem:[%s6226_s3 + $0x98] sm:$0xff]  ;;  %v3835_v23 = vld [vmem:[%s6226_s3 + $0x90] sm:$0xff] }
 0x26e   :  { %v1015_v27 = vpop.f32.mrf.mxu0  ;;  %4637 = vmatprep.subr.mxu1 %v3836_v22 }
 0x26f   :  { %v1016_v28 = vadd.f32 %v5308_v52, %v1015_v27  ;;  %4548 = vmatprep.mubr.msk.f32.mxu1 %vm429_vm1, %v1124_v24  ;;  %v1127_v31 = vmax.f32 %v1021_v26, 0.0  ;;  %4638 = vmatpush3.msra.mxu1 %v3836_v22  ;;  %v3834_v24 = vld [vmem:[%s6226_s3 + $0x88] sm:$0xff]  ;;  %v5392_v26 = vld [vmem:[%s6227_s4 + $0x3] ss:$0 sm:$0xff] }
 0x270   :  { %v4500_v29 = vpop.f32.mrf.mxu0  ;;  %4549 = vmatmul.mubr.msk.f32.gmra.mxu1 %vm429_vm1, %v1125_v25  ;;  %4639 = vmatprep.subr.mxu1 %v3835_v23  ;;  %v3833_v25 = vld [vmem:[%s6226_s3 + $0x80] sm:$0xff] }
 0x271   :  { %v1126_v30 = vmax.f32 %v1016_v28, 0.0  ;;  %v1031_v32 = vadd.f32 %v4500_v29, %v5308_v52  ;;  %4640 = vmatpush3.msra.mxu1 %v3835_v23 }
 0x272   :  { %v1025_v33 = vpop.f32.mrf.mxu0  ;;  %4641 = vmatprep.subr.mxu1 %v3834_v24 }
 0x273   :  { %v1026_v34 = vadd.f32 %v5308_v52, %v1025_v33  ;;  %4551 = vmatprep.mubr.msk.f32.mxu1 %vm429_vm1, %v1126_v30  ;;  %v1129_v37 = vmax.f32 %v1031_v32, 0.0  ;;  %4642 = vmatpush3.msra.mxu1 %v3834_v24 }
 0x274   :  { %v4503_v35 = vpop.f32.mrf.mxu0  ;;  %4552 = vmatmul.mubr.msk.f32.gmra.mxu1 %vm429_vm1, %v1127_v31  ;;  %4643 = vmatprep.subr.mxu1 %v3833_v25 }
 0x275   :  { %v1128_v36 = vmax.f32 %v1026_v34, 0.0  ;;  %v1041_v38 = vadd.f32 %v4503_v35, %v5308_v52  ;;  %4644 = vmatpush3.msra.mxu1 %v3833_v25 }
 0x276   :  { %v1035_v39 = vpop.f32.mrf.mxu0 }
 0x277   :  { %v1036_v40 = vadd.f32 %v5308_v52, %v1035_v39  ;;  %4554 = vmatprep.mubr.msk.f32.mxu1 %vm429_vm1, %v1128_v36  ;;  %v1131_v44 = vmax.f32 %v1041_v38, 0.0 }
 0x278   :  { %v4506_v42 = vpop.f32.mrf.mxu0  ;;  %4555 = vmatmul.mubr.msk.f32.gmra.mxu1 %vm429_vm1, %v1129_v37 }
 0x279   :  { %v1130_v43 = vmax.f32 %v1036_v40, 0.0  ;;  %v1051_v45 = vadd.f32 %v4506_v42, %v5308_v52 }
 0x27a   :  { %v1045_v46 = vpop.f32.mrf.mxu0 }
 0x27b   :  { %v1046_v47 = vadd.f32 %v5308_v52, %v1045_v46  ;;  %4557 = vmatprep.mubr.msk.f32.mxu1 %vm429_vm1, %v1130_v43  ;;  %v1133_v50 = vmax.f32 %v1051_v45, 0.0 }
 0x27c   :  { %v4509_v48 = vpop.f32.mrf.mxu0  ;;  %4558 = vmatmul.mubr.msk.f32.gmra.mxu1 %vm429_vm1, %v1131_v44 }
 0x27d   :  { %v1132_v49 = vmax.f32 %v1046_v47, 0.0  ;;  %v1061_v14 = vadd.f32 %v4509_v48, %v5308_v52 }
 0x27e   :  { %v1055_v51 = vpop.f32.mrf.mxu0 }
 0x27f   :  { %v1056_v53 = vadd.f32 %v5308_v52, %v1055_v51  ;;  %4560 = vmatprep.mubr.msk.f32.mxu1 %vm429_vm1, %v1132_v49  ;;  %v1135_v56 = vmax.f32 %v1061_v14, 0.0 }
 0x280   :  { %v4512_v54 = vpop.f32.mrf.mxu0  ;;  %4561 = vmatmul.mubr.msk.f32.gmra.mxu1 %vm429_vm1, %v1133_v50 }
 0x281   :  { %v1134_v55 = vmax.f32 %v1056_v53, 0.0  ;;  %v1071_v57 = vadd.f32 %v4512_v54, %v5308_v52 }
 0x282   :  { %v1065_v58 = vpop.f32.mrf.mxu0 }
 0x283   :  { %v1066_v59 = vadd.f32 %v5308_v52, %v1065_v58  ;;  %4563 = vmatprep.mubr.msk.f32.mxu1 %vm429_vm1, %v1134_v55  ;;  %v1137_v62 = vmax.f32 %v1071_v57, 0.0 }
 0x284   :  { %v4515_v60 = vpop.f32.mrf.mxu0  ;;  %4564 = vmatmul.mubr.msk.f32.gmra.mxu1 %vm429_vm1, %v1135_v56 }
 0x285   :  { %v1136_v61 = vmax.f32 %v1066_v59, 0.0  ;;  %v1081_v63 = vadd.f32 %v4515_v60, %v5308_v52 }
 0x286   :  { %v1075_v0 = vpop.f32.mrf.mxu0 }
 0x287   :  { %v1076_v1 = vadd.f32 %v5308_v52, %v1075_v0  ;;  %4566 = vmatprep.mubr.msk.f32.mxu1 %vm429_vm1, %v1136_v61  ;;  %v1139_v4 = vmax.f32 %v1081_v63, 0.0 }
 0x288   :  { %v4518_v2 = vpop.f32.mrf.mxu0  ;;  %4567 = vmatmul.mubr.msk.f32.gmra.mxu1 %vm429_vm1, %v1137_v62 }
 0x289   :  { %v1138_v3 = vmax.f32 %v1076_v1, 0.0  ;;  %v1091_v5 = vadd.f32 %v4518_v2, %v5308_v52 }
 0x28a   :  { %v1085_v6 = vpop.f32.mrf.mxu0 }
 0x28b   :  { %v1086_v7 = vadd.f32 %v5308_v52, %v1085_v6  ;;  %4569 = vmatprep.mubr.msk.f32.mxu1 %vm429_vm1, %v1138_v3  ;;  %v1141_v10 = vmax.f32 %v1091_v5, 0.0 }
 0x28c   :  { %v4521_v8 = vpop.f32.mrf.mxu0  ;;  %4570 = vmatmul.mubr.msk.f32.gmra.mxu1 %vm429_vm1, %v1139_v4 }
 0x28d   :  { %v1140_v9 = vmax.f32 %v1086_v7, 0.0  ;;  %v1101_v11 = vadd.f32 %v4521_v8, %v5308_v52 }
 0x28e   :  { %v1095_v12 = vpop.f32.mrf.mxu0 }
 0x28f   :  { %v1096_v41 = vadd.f32 %v5308_v52, %v1095_v12  ;;  %4572 = vmatprep.mubr.msk.f32.mxu1 %vm429_vm1, %v1140_v9  ;;  %v1143_v16 = vmax.f32 %v1101_v11, 0.0 }
 0x290   :  { %v4524_v13 = vpop.f32.mrf.mxu0  ;;  %4573 = vmatmul.mubr.msk.f32.gmra.mxu1 %vm429_vm1, %v1141_v10 }
 0x291   :  { %v1142_v15 = vmax.f32 %v1096_v41, 0.0  ;;  %v1111_v17 = vadd.f32 %v4524_v13, %v5308_v52 }
 0x292   :  { %v1105_v18 = vpop.f32.mrf.mxu0 }
 0x293   :  { %v1106_v19 = vadd.f32 %v5308_v52, %v1105_v18  ;;  %4575 = vmatprep.mubr.msk.f32.mxu1 %vm429_vm1, %v1142_v15  ;;  %v1145_v21 = vmax.f32 %v1111_v17, 0.0  ;;  %v2203_v52 = vld [vmem:[%s6228_s2] sm:$0xff] }
 0x294   :  { %4576 = vmatmul.mubr.msk.f32.gmra.mxu1 %vm429_vm1, %v1143_v16  ;;  %4693 = vmatprep.subr.mxu0 %v2203_v52 }
 0x295   :  { %v1144_v20 = vmax.f32 %v1106_v19, 0.0 }
 0x297   :  { %4578 = vmatprep.mubr.msk.f32.mxu1 %vm429_vm1, %v1144_v20 }
 0x298   :  { %4579 = vmatmul.mubr.msk.f32.gmra.mxu1 %vm429_vm1, %v1145_v21 }
 0x31c   :  { %v4535_v27 = vpop.f32.mrf.mxu1 }
 0x31d   :  { %v1324_v28 = vadd.f32 %v4535_v27, %v5392_v26 }
 0x31e   :  { %v1318_v29 = vpop.f32.mrf.mxu1 }
 0x31f   :  { %v1319_v30 = vadd.f32 %v5392_v26, %v1318_v29  ;;  %v1478_v33 = vmax.f32 %v1324_v28, 0.0 }
 0x320   :  { %v4538_v31 = vpop.f32.mrf.mxu1 }
 0x321   :  { %v1477_v32 = vmax.f32 %v1319_v30, 0.0  ;;  %v1334_v34 = vadd.f32 %v4538_v31, %v5392_v26 }
 0x322   :  { %v1328_v35 = vpop.f32.mrf.mxu1 }
 0x323   :  { %v1329_v36 = vadd.f32 %v5392_v26, %v1328_v35  ;;  %4589 = vmatprep.mubr.msk.f32.mxu0 %vm429_vm1, %v1477_v32  ;;  %v1480_v39 = vmax.f32 %v1334_v34, 0.0 }
 0x324   :  { %v4541_v37 = vpop.f32.mrf.mxu1  ;;  %4590 = vmatmul.mubr.msk.f32.vlgmr.msra.gmra.mxu0 %vm429_vm1, %v1478_v33 }
 0x325   :  { %v1479_v38 = vmax.f32 %v1329_v36, 0.0  ;;  %4694 = vmatpush3.msra.mxu0 %v2203_v52  ;;  %v1344_v40 = vadd.f32 %v4541_v37, %v5392_v26 }
 0x326   :  { %v1338_v42 = vpop.f32.mrf.mxu1 }
 0x327   :  { %v1339_v43 = vadd.f32 %v5392_v26, %v1338_v42  ;;  %4592 = vmatprep.mubr.msk.f32.mxu0 %vm429_vm1, %v1479_v38  ;;  %v1482_v46 = vmax.f32 %v1344_v40, 0.0 }
 0x328   :  { %v4544_v44 = vpop.f32.mrf.mxu1  ;;  %4593 = vmatmul.mubr.msk.f32.gmra.mxu0 %vm429_vm1, %v1480_v39 }
 0x329   :  { %v1481_v45 = vmax.f32 %v1339_v43, 0.0  ;;  %v1354_v47 = vadd.f32 %v4544_v44, %v5392_v26 }
 0x32a   :  { %v1348_v48 = vpop.f32.mrf.mxu1 }
 0x32b   :  { %v1349_v49 = vadd.f32 %v5392_v26, %v1348_v48  ;;  %4595 = vmatprep.mubr.msk.f32.mxu0 %vm429_vm1, %v1481_v45  ;;  %v1484_v51 = vmax.f32 %v1354_v47, 0.0 }
 0x32c   :  { %v4547_v50 = vpop.f32.mrf.mxu1  ;;  %4596 = vmatmul.mubr.msk.f32.gmra.mxu0 %vm429_vm1, %v1482_v46 }
 0x32d   :  { %v1483_v14 = vmax.f32 %v1349_v49, 0.0  ;;  %v1364_v53 = vadd.f32 %v4547_v50, %v5392_v26 }
 0x32e   :  { %v1358_v54 = vpop.f32.mrf.mxu1 }
 0x32f   :  { %v1359_v55 = vadd.f32 %v5392_v26, %v1358_v54  ;;  %4598 = vmatprep.mubr.msk.f32.mxu0 %vm429_vm1, %v1483_v14  ;;  %v1486_v58 = vmax.f32 %v1364_v53, 0.0 }
 0x330   :  { %v4550_v56 = vpop.f32.mrf.mxu1  ;;  %4599 = vmatmul.mubr.msk.f32.gmra.mxu0 %vm429_vm1, %v1484_v51 }
 0x331   :  { %v1485_v57 = vmax.f32 %v1359_v55, 0.0  ;;  %v1374_v59 = vadd.f32 %v4550_v56, %v5392_v26 }
 0x332   :  { %v1368_v60 = vpop.f32.mrf.mxu1 }
 0x333   :  { %v1369_v61 = vadd.f32 %v5392_v26, %v1368_v60  ;;  %4601 = vmatprep.mubr.msk.f32.mxu0 %vm429_vm1, %v1485_v57  ;;  %v1488_v0 = vmax.f32 %v1374_v59, 0.0 }
 0x334   :  { %v4553_v62 = vpop.f32.mrf.mxu1  ;;  %4602 = vmatmul.mubr.msk.f32.gmra.mxu0 %vm429_vm1, %v1486_v58 }
 0x335   :  { %v1487_v63 = vmax.f32 %v1369_v61, 0.0  ;;  %v1384_v1 = vadd.f32 %v4553_v62, %v5392_v26  ;;  %v4911_v61 = vld [vmem:[%s6225_s0] sm:$0xff]  ;;  %v4913_v62 = vld [vmem:[%s6225_s0 + $0x10] sm:$0xff] }
 0x336   :  { %v1378_v2 = vpop.f32.mrf.mxu1 }
 0x337   :  { %v1379_v3 = vadd.f32 %v5392_v26, %v1378_v2  ;;  %4604 = vmatprep.mubr.msk.f32.mxu0 %vm429_vm1, %v1487_v63  ;;  %v1490_v6 = vmax.f32 %v1384_v1, 0.0  ;;  %v4914_v63 = vld [vmem:[%s6225_s0 + $0x18] sm:$0xff]  ;;  %v4916_v1 = vld [vmem:[%s6225_s0 + $0x28] sm:$0xff]  ;;  %v4917_v2 = vld [vmem:[%s6225_s0 + $0x30] sm:$0xff] }
 0x338   :  { %v4556_v4 = vpop.f32.mrf.mxu1  ;;  %4605 = vmatmul.mubr.msk.f32.gmra.mxu0 %vm429_vm1, %v1488_v0  ;;  %v4915_v0 = vld [vmem:[%s6225_s0 + $0x20] sm:$0xff] }
 0x339   :  { %v1489_v5 = vmax.f32 %v1379_v3, 0.0  ;;  %v1394_v7 = vadd.f32 %v4556_v4, %v5392_v26  ;;  %v4918_v3 = vld [vmem:[%s6225_s0 + $0x38] sm:$0xff]  ;;  %v4919_v4 = vld [vmem:[%s6225_s0 + $0x40] sm:$0xff] }
 0x33a   :  { %v1388_v8 = vpop.f32.mrf.mxu1 }
 0x33b   :  { %v1389_v9 = vadd.f32 %v5392_v26, %v1388_v8  ;;  %4607 = vmatprep.mubr.msk.f32.mxu0 %vm429_vm1, %v1489_v5  ;;  %v1492_v12 = vmax.f32 %v1394_v7, 0.0  ;;  %v4920_v5 = vld [vmem:[%s6225_s0 + $0x48] sm:$0xff]  ;;  %v4922_v7 = vld [vmem:[%s6225_s0 + $0x58] sm:$0xff]  ;;  %v4923_v8 = vld [vmem:[%s6225_s0 + $0x60] sm:$0xff] }
 0x33c   :  { %v4559_v10 = vpop.f32.mrf.mxu1  ;;  %4608 = vmatmul.mubr.msk.f32.gmra.mxu0 %vm429_vm1, %v1490_v6  ;;  %v4921_v6 = vld [vmem:[%s6225_s0 + $0x50] sm:$0xff] }
 0x33d   :  { %v1491_v11 = vmax.f32 %v1389_v9, 0.0  ;;  %v1404_v41 = vadd.f32 %v4559_v10, %v5392_v26  ;;  %v4924_v9 = vld [vmem:[%s6225_s0 + $0x68] sm:$0xff]  ;;  %v4925_v10 = vld [vmem:[%s6225_s0 + $0x70] sm:$0xff] }
 0x33e   :  { %v1398_v13 = vpop.f32.mrf.mxu1 }
 0x33f   :  { %v1399_v15 = vadd.f32 %v5392_v26, %v1398_v13  ;;  %4610 = vmatprep.mubr.msk.f32.mxu0 %vm429_vm1, %v1491_v11  ;;  %v1494_v18 = vmax.f32 %v1404_v41, 0.0  ;;  %v4926_v11 = vld [vmem:[%s6225_s0 + $0x78] sm:$0xff]  ;;  %v4928_v41 = vld [vmem:[%s6225_s0 + $0x88] sm:$0xff]  ;;  %v4929_v13 = vld [vmem:[%s6225_s0 + $0x90] sm:$0xff] }
 0x340   :  { %v4562_v16 = vpop.f32.mrf.mxu1  ;;  %4611 = vmatmul.mubr.msk.f32.gmra.mxu0 %vm429_vm1, %v1492_v12  ;;  %v4927_v12 = vld [vmem:[%s6225_s0 + $0x80] sm:$0xff] }
 0x341   :  { %v1493_v17 = vmax.f32 %v1399_v15, 0.0  ;;  %v1414_v19 = vadd.f32 %v4562_v16, %v5392_v26  ;;  %v4930_v15 = vld [vmem:[%s6225_s0 + $0x98] sm:$0xff]  ;;  %v4931_v16 = vld [vmem:[%s6225_s0 + $0xa0] sm:$0xff] }
 0x342   :  { %v1408_v20 = vpop.f32.mrf.mxu1 }
 0x343   :  { %v1409_v21 = vadd.f32 %v5392_v26, %v1408_v20  ;;  %4613 = vmatprep.mubr.msk.f32.mxu0 %vm429_vm1, %v1493_v17  ;;  %v1496_v52 = vmax.f32 %v1414_v19, 0.0  ;;  %v4932_v17 = vld [vmem:[%s6225_s0 + $0xa8] sm:$0xff]  ;;  %v4934_v19 = vld [vmem:[%s6225_s0 + $0xb8] sm:$0xff]  ;;  %v4935_v20 = vld [vmem:[%s6225_s0 + $0xc0] sm:$0xff] }
 0x344   :  { %v4565_v22 = vpop.f32.mrf.mxu1  ;;  %4614 = vmatmul.mubr.msk.f32.gmra.mxu0 %vm429_vm1, %v1494_v18  ;;  %v4933_v18 = vld [vmem:[%s6225_s0 + $0xb0] sm:$0xff] }
 0x345   :  { %v1495_v23 = vmax.f32 %v1409_v21, 0.0  ;;  %v1424_v24 = vadd.f32 %v4565_v22, %v5392_v26  ;;  %v4936_v21 = vld [vmem:[%s6225_s0 + $0xc8] sm:$0xff]  ;;  %v4937_v22 = vld [vmem:[%s6225_s0 + $0xd0] sm:$0xff] }
 0x346   :  { %v1418_v25 = vpop.f32.mrf.mxu1 }
 0x347   :  { %v1419_v27 = vadd.f32 %v5392_v26, %v1418_v25  ;;  %4616 = vmatprep.mubr.msk.f32.mxu0 %vm429_vm1, %v1495_v23  ;;  %v1498_v30 = vmax.f32 %v1424_v24, 0.0  ;;  %v4938_v23 = vld [vmem:[%s6225_s0 + $0xd8] sm:$0xff]  ;;  %v4940_v24 = vld [vmem:[%s6225_s0 + $0xe8] sm:$0xff]  ;;  %v4941_v25 = vld [vmem:[%s6225_s0 + $0xf0] sm:$0xff] }
 0x348   :  { %v4568_v28 = vpop.f32.mrf.mxu1  ;;  %4617 = vmatmul.mubr.msk.f32.gmra.mxu0 %vm429_vm1, %v1496_v52  ;;  %v4939_v52 = vld [vmem:[%s6225_s0 + $0xe0] sm:$0xff] }
 0x349   :  { %v1497_v29 = vmax.f32 %v1419_v27, 0.0  ;;  %v1434_v31 = vadd.f32 %v4568_v28, %v5392_v26  ;;  %v4942_v27 = vld [vmem:[%s6225_s0 + $0xf8] sm:$0xff] }
 0x34a   :  { %v1428_v32 = vpop.f32.mrf.mxu1  ;;  %v3905_v28 = vld [vmem:[%s6226_s3 + $0xb8] sm:$0xff] }
 0x34b   :  { %v1429_v33 = vadd.f32 %v5392_v26, %v1428_v32  ;;  %4619 = vmatprep.mubr.msk.f32.mxu0 %vm429_vm1, %v1497_v29  ;;  %v1500_v36 = vmax.f32 %v1434_v31, 0.0  ;;  %4743 = vmatprep.subr.mxu1 %v3905_v28  ;;  %v5592_v29 = vld [vmem:[%s6227_s4 + $0x4] ss:$0 sm:$0xff] }
 0x34c   :  { %v4571_v34 = vpop.f32.mrf.mxu1  ;;  %4620 = vmatmul.mubr.msk.f32.gmra.mxu0 %vm429_vm1, %v1498_v30 }
 0x34d   :  { %v1499_v35 = vmax.f32 %v1429_v33, 0.0  ;;  %v1444_v37 = vadd.f32 %v4571_v34, %v5392_v26 }
 0x34e   :  { %v1438_v38 = vpop.f32.mrf.mxu1 }
 0x34f   :  { %v1439_v39 = vadd.f32 %v5392_v26, %v1438_v38  ;;  %4622 = vmatprep.mubr.msk.f32.mxu0 %vm429_vm1, %v1499_v35  ;;  %v1502_v43 = vmax.f32 %v1444_v37, 0.0 }
 0x350   :  { %v4574_v40 = vpop.f32.mrf.mxu1  ;;  %4623 = vmatmul.mubr.msk.f32.gmra.mxu0 %vm429_vm1, %v1500_v36 }
 0x351   :  { %v1501_v42 = vmax.f32 %v1439_v39, 0.0  ;;  %v1454_v44 = vadd.f32 %v4574_v40, %v5392_v26  ;;  %v3904_v40 = vld [vmem:[%s6226_s3 + $0xb0] sm:$0xff] }
 0x352   :  { %v1448_v45 = vpop.f32.mrf.mxu1 }
 0x353   :  { %v1449_v46 = vadd.f32 %v5392_v26, %v1448_v45  ;;  %4625 = vmatprep.mubr.msk.f32.mxu0 %vm429_vm1, %v1501_v42  ;;  %v1504_v49 = vmax.f32 %v1454_v44, 0.0  ;;  %v3903_v44 = vld [vmem:[%s6226_s3 + $0xa8] sm:$0xff] }
 0x354   :  { %v4577_v47 = vpop.f32.mrf.mxu1  ;;  %4626 = vmatmul.mubr.msk.f32.gmra.mxu0 %vm429_vm1, %v1502_v43 }
 0x355   :  { %v1503_v48 = vmax.f32 %v1449_v46, 0.0  ;;  %v1464_v50 = vadd.f32 %v4577_v47, %v5392_v26 }
 0x356   :  { %v1458_v14 = vpop.f32.mrf.mxu1 }
 0x357   :  { %v1459_v51 = vadd.f32 %v5392_v26, %v1458_v14  ;;  %4628 = vmatprep.mubr.msk.f32.mxu0 %vm429_vm1, %v1503_v48  ;;  %v1506_v55 = vmax.f32 %v1464_v50, 0.0 }
 0x358   :  { %v4580_v53 = vpop.f32.mrf.mxu1  ;;  %4629 = vmatmul.mubr.msk.f32.gmra.mxu0 %vm429_vm1, %v1504_v49  ;;  %v3902_v49 = vld [vmem:[%s6226_s3 + $0xa0] sm:$0xff] }
 0x359   :  { %v1505_v54 = vmax.f32 %v1459_v51, 0.0  ;;  %v1474_v56 = vadd.f32 %v4580_v53, %v5392_v26 }
 0x35a   :  { %v1468_v57 = vpop.f32.mrf.mxu1 }
 0x35b   :  { %v1469_v58 = vadd.f32 %v5392_v26, %v1468_v57  ;;  %4631 = vmatprep.mubr.msk.f32.mxu0 %vm429_vm1, %v1505_v54  ;;  %v1508_v60 = vmax.f32 %v1474_v56, 0.0  ;;  %v4912_v26 = vld [vmem:[%s6225_s0 + $0x8] sm:$0xff] }
 0x35c   :  { %4632 = vmatmul.mubr.msk.f32.gmra.mxu0 %vm429_vm1, %v1506_v55 }
 0x35d   :  { %v1507_v59 = vmax.f32 %v1469_v58, 0.0 }
 0x35f   :  { %4634 = vmatprep.mubr.msk.f32.mxu0 %vm429_vm1, %v1507_v59 }
 0x360   :  { %4635 = vmatmul.mubr.msk.f32.gmra.mxu0 %vm429_vm1, %v1508_v60 }
 0x361   :  { %4695 = vmatprep.mubr.msk.f32.mxu0 %vm66_vm0, %v4911_v61 }
 0x364   :  { %4696 = vmatmul.mubr.msk.f32.vlgmr.msra.gmra.mxu0 %vm66_vm0, %v4912_v26 }
 0x365   :  { %4698 = vmatprep.mubr.msk.f32.mxu0 %vm66_vm0, %v4913_v62 }
 0x368   :  { %4699 = vmatmul.mubr.msk.f32.gmra.mxu0 %vm66_vm0, %v4914_v63 }
 0x369   :  { %4701 = vmatprep.mubr.msk.f32.mxu0 %vm66_vm0, %v4915_v0 }
 0x36c   :  { %4702 = vmatmul.mubr.msk.f32.gmra.mxu0 %vm66_vm0, %v4916_v1 }
 0x36d   :  { %4704 = vmatprep.mubr.msk.f32.mxu0 %vm66_vm0, %v4917_v2 }
 0x370   :  { %4705 = vmatmul.mubr.msk.f32.gmra.mxu0 %vm66_vm0, %v4918_v3 }
 0x371   :  { %4707 = vmatprep.mubr.msk.f32.mxu0 %vm66_vm0, %v4919_v4 }
 0x374   :  { %4708 = vmatmul.mubr.msk.f32.gmra.mxu0 %vm66_vm0, %v4920_v5 }
 0x375   :  { %4710 = vmatprep.mubr.msk.f32.mxu0 %vm66_vm0, %v4921_v6 }
 0x378   :  { %4711 = vmatmul.mubr.msk.f32.gmra.mxu0 %vm66_vm0, %v4922_v7 }
 0x379   :  { %4713 = vmatprep.mubr.msk.f32.mxu0 %vm66_vm0, %v4923_v8 }
 0x37c   :  { %4714 = vmatmul.mubr.msk.f32.gmra.mxu0 %vm66_vm0, %v4924_v9 }
 0x37d   :  { %4716 = vmatprep.mubr.msk.f32.mxu0 %vm66_vm0, %v4925_v10 }
 0x380   :  { %4717 = vmatmul.mubr.msk.f32.gmra.mxu0 %vm66_vm0, %v4926_v11 }
 0x381   :  { %4719 = vmatprep.mubr.msk.f32.mxu0 %vm66_vm0, %v4927_v12 }
 0x384   :  { %4720 = vmatmul.mubr.msk.f32.gmra.mxu0 %vm66_vm0, %v4928_v41 }
 0x385   :  { %4722 = vmatprep.mubr.msk.f32.mxu0 %vm66_vm0, %v4929_v13 }
 0x388   :  { %4723 = vmatmul.mubr.msk.f32.gmra.mxu0 %vm66_vm0, %v4930_v15 }
 0x389   :  { %4725 = vmatprep.mubr.msk.f32.mxu0 %vm66_vm0, %v4931_v16 }
 0x38c   :  { %4726 = vmatmul.mubr.msk.f32.gmra.mxu0 %vm66_vm0, %v4932_v17 }
 0x38d   :  { %4728 = vmatprep.mubr.msk.f32.mxu0 %vm66_vm0, %v4933_v18 }
 0x390   :  { %4729 = vmatmul.mubr.msk.f32.gmra.mxu0 %vm66_vm0, %v4934_v19 }
 0x391   :  { %4731 = vmatprep.mubr.msk.f32.mxu0 %vm66_vm0, %v4935_v20 }
 0x394   :  { %4732 = vmatmul.mubr.msk.f32.gmra.mxu0 %vm66_vm0, %v4936_v21 }
 0x395   :  { %4734 = vmatprep.mubr.msk.f32.mxu0 %vm66_vm0, %v4937_v22 }
 0x398   :  { %4735 = vmatmul.mubr.msk.f32.gmra.mxu0 %vm66_vm0, %v4938_v23 }
 0x399   :  { %4737 = vmatprep.mubr.msk.f32.mxu0 %vm66_vm0, %v4939_v52 }
 0x39c   :  { %4738 = vmatmul.mubr.msk.f32.gmra.mxu0 %vm66_vm0, %v4940_v24 }
 0x39d   :  { %4740 = vmatprep.mubr.msk.f32.mxu0 %vm66_vm0, %v4941_v25 }
 0x3a0   :  { %4741 = vmatmul.mubr.msk.f32.gmra.mxu0 %vm66_vm0, %v4942_v27 }
 0x3e4   :  { %v4591_v30 = vpop.f32.mrf.mxu0 }
 0x3e5   :  { %v1687_v31 = vadd.f32 %v4591_v30, %v5592_v29 }
 0x3e6   :  { %v1681_v32 = vpop.f32.mrf.mxu0 }
 0x3e7   :  { %v1682_v33 = vadd.f32 %v5592_v29, %v1681_v32  ;;  %v1841_v36 = vmax.f32 %v1687_v31, 0.0 }
 0x3e8   :  { %v4594_v34 = vpop.f32.mrf.mxu0 }
 0x3e9   :  { %v1840_v35 = vmax.f32 %v1682_v33, 0.0  ;;  %v1697_v37 = vadd.f32 %v4594_v34, %v5592_v29 }
 0x3ea   :  { %v1691_v38 = vpop.f32.mrf.mxu0 }
 0x3eb   :  { %v1692_v39 = vadd.f32 %v5592_v29, %v1691_v38  ;;  %4645 = vmatprep.mubr.msk.f32.mxu1 %vm429_vm1, %v1840_v35  ;;  %v1843_v45 = vmax.f32 %v1697_v37, 0.0 }
 0x3ec   :  { %v4597_v42 = vpop.f32.mrf.mxu0  ;;  %4646 = vmatmul.mubr.msk.f32.vlgmr.msra.gmra.mxu1 %vm429_vm1, %v1841_v36 }
 0x3ed   :  { %v1842_v43 = vmax.f32 %v1692_v39, 0.0  ;;  %4744 = vmatpush3.msra.mxu1 %v3905_v28  ;;  %v1707_v46 = vadd.f32 %v4597_v42, %v5592_v29 }
 0x3ee   :  { %v1701_v47 = vpop.f32.mrf.mxu0  ;;  %4745 = vmatprep.subr.mxu1 %v3904_v40 }
 0x3ef   :  { %v1702_v48 = vadd.f32 %v5592_v29, %v1701_v47  ;;  %4648 = vmatprep.mubr.msk.f32.mxu1 %vm429_vm1, %v1842_v43  ;;  %4746 = vmatpush3.msra.mxu1 %v3904_v40  ;;  %v1845_v51 = vmax.f32 %v1707_v46, 0.0 }
 0x3f0   :  { %v4600_v50 = vpop.f32.mrf.mxu0  ;;  %4649 = vmatmul.mubr.msk.f32.gmra.mxu1 %vm429_vm1, %v1843_v45  ;;  %4747 = vmatprep.subr.mxu1 %v3903_v44 }
 0x3f1   :  { %v1844_v14 = vmax.f32 %v1702_v48, 0.0  ;;  %4748 = vmatpush3.msra.mxu1 %v3903_v44  ;;  %v1717_v53 = vadd.f32 %v4600_v50, %v5592_v29 }
 0x3f2   :  { %v1711_v54 = vpop.f32.mrf.mxu0  ;;  %4749 = vmatprep.subr.mxu1 %v3902_v49 }
 0x3f3   :  { %v1712_v55 = vadd.f32 %v5592_v29, %v1711_v54  ;;  %4651 = vmatprep.mubr.msk.f32.mxu1 %vm429_vm1, %v1844_v14  ;;  %4750 = vmatpush3.msra.mxu1 %v3902_v49  ;;  %v1847_v58 = vmax.f32 %v1717_v53, 0.0 }
 0x3f4   :  { %v4603_v56 = vpop.f32.mrf.mxu0  ;;  %4652 = vmatmul.mubr.msk.f32.gmra.mxu1 %vm429_vm1, %v1845_v51 }
 0x3f5   :  { %v1846_v57 = vmax.f32 %v1712_v55, 0.0  ;;  %v1727_v59 = vadd.f32 %v4603_v56, %v5592_v29 }
 0x3f6   :  { %v1721_v60 = vpop.f32.mrf.mxu0 }
 0x3f7   :  { %v1722_v61 = vadd.f32 %v5592_v29, %v1721_v60  ;;  %4654 = vmatprep.mubr.msk.f32.mxu1 %vm429_vm1, %v1846_v57  ;;  %v1849_v63 = vmax.f32 %v1727_v59, 0.0 }
 0x3f8   :  { %v4606_v26 = vpop.f32.mrf.mxu0  ;;  %4655 = vmatmul.mubr.msk.f32.gmra.mxu1 %vm429_vm1, %v1847_v58 }
 0x3f9   :  { %v1848_v62 = vmax.f32 %v1722_v61, 0.0  ;;  %v1737_v0 = vadd.f32 %v4606_v26, %v5592_v29 }
 0x3fa   :  { %v1731_v1 = vpop.f32.mrf.mxu0 }
 0x3fb   :  { %v1732_v2 = vadd.f32 %v5592_v29, %v1731_v1  ;;  %4657 = vmatprep.mubr.msk.f32.mxu1 %vm429_vm1, %v1848_v62  ;;  %v1851_v5 = vmax.f32 %v1737_v0, 0.0 }
 0x3fc   :  { %v4609_v3 = vpop.f32.mrf.mxu0  ;;  %4658 = vmatmul.mubr.msk.f32.gmra.mxu1 %vm429_vm1, %v1849_v63 }
 0x3fd   :  { %v1850_v4 = vmax.f32 %v1732_v2, 0.0  ;;  %v1747_v6 = vadd.f32 %v4609_v3, %v5592_v29  ;;  %v3942_v3 = vld [vmem:[%s6226_s3 + $0xd8] sm:$0xff] }
 0x3fe   :  { %v1741_v7 = vpop.f32.mrf.mxu0  ;;  %4799 = vmatprep.subr.mxu0 %v3942_v3 }
 0x3ff   :  { %v1742_v8 = vadd.f32 %v5592_v29, %v1741_v7  ;;  %4660 = vmatprep.mubr.msk.f32.mxu1 %vm429_vm1, %v1850_v4  ;;  %v1853_v11 = vmax.f32 %v1747_v6, 0.0  ;;  %v3941_v4 = vld [vmem:[%s6226_s3 + $0xd0] sm:$0xff]  ;;  %4800 = vmatpush3.msra.mxu0 %v3942_v3  ;;  %v3939_v6 = vld [vmem:[%s6226_s3 + $0xc0] sm:$0xff] }
 0x400   :  { %v4612_v9 = vpop.f32.mrf.mxu0  ;;  %4661 = vmatmul.mubr.msk.f32.gmra.mxu1 %vm429_vm1, %v1851_v5  ;;  %v3940_v5 = vld [vmem:[%s6226_s3 + $0xc8] sm:$0xff]  ;;  %4801 = vmatprep.subr.mxu0 %v3941_v4 }
 0x401   :  { %v1852_v10 = vmax.f32 %v1742_v8, 0.0  ;;  %v1757_v12 = vadd.f32 %v4612_v9, %v5592_v29  ;;  %4802 = vmatpush3.msra.mxu0 %v3941_v4 }
 0x402   :  { %v1751_v41 = vpop.f32.mrf.mxu0  ;;  %4803 = vmatprep.subr.mxu0 %v3940_v5 }
 0x403   :  { %v1752_v13 = vadd.f32 %v5592_v29, %v1751_v41  ;;  %4663 = vmatprep.mubr.msk.f32.mxu1 %vm429_vm1, %v1852_v10  ;;  %v1855_v17 = vmax.f32 %v1757_v12, 0.0  ;;  %4804 = vmatpush3.msra.mxu0 %v3940_v5 }
 0x404   :  { %v4615_v15 = vpop.f32.mrf.mxu0  ;;  %4664 = vmatmul.mubr.msk.f32.gmra.mxu1 %vm429_vm1, %v1853_v11  ;;  %4805 = vmatprep.subr.mxu0 %v3939_v6 }
 0x405   :  { %v1854_v16 = vmax.f32 %v1752_v13, 0.0  ;;  %v1767_v18 = vadd.f32 %v4615_v15, %v5592_v29  ;;  %4806 = vmatpush3.msra.mxu0 %v3939_v6 }
 0x406   :  { %v1761_v19 = vpop.f32.mrf.mxu0 }
 0x407   :  { %v1762_v20 = vadd.f32 %v5592_v29, %v1761_v19  ;;  %4666 = vmatprep.mubr.msk.f32.mxu1 %vm429_vm1, %v1854_v16  ;;  %v1857_v23 = vmax.f32 %v1767_v18, 0.0 }
 0x408   :  { %v4618_v21 = vpop.f32.mrf.mxu0  ;;  %4667 = vmatmul.mubr.msk.f32.gmra.mxu1 %vm429_vm1, %v1855_v17 }
 0x409   :  { %v1856_v22 = vmax.f32 %v1762_v20, 0.0  ;;  %v1777_v52 = vadd.f32 %v4618_v21, %v5592_v29  ;;  %v5692_v20 = vld [vmem:[%s6227_s4 + $0x5] ss:$0 sm:$0xff] }
 0x40a   :  { %v1771_v24 = vpop.f32.mrf.mxu0 }
 0x40b   :  { %v1772_v25 = vadd.f32 %v5592_v29, %v1771_v24  ;;  %4669 = vmatprep.mubr.msk.f32.mxu1 %vm429_vm1, %v1856_v22  ;;  %v1859_v30 = vmax.f32 %v1777_v52, 0.0 }
 0x40c   :  { %v4621_v27 = vpop.f32.mrf.mxu0  ;;  %4670 = vmatmul.mubr.msk.f32.gmra.mxu1 %vm429_vm1, %v1857_v23 }
 0x40d   :  { %v1858_v28 = vmax.f32 %v1772_v25, 0.0  ;;  %v1787_v31 = vadd.f32 %v4621_v27, %v5592_v29 }
 0x40e   :  { %v1781_v32 = vpop.f32.mrf.mxu0 }
 0x40f   :  { %v1782_v33 = vadd.f32 %v5592_v29, %v1781_v32  ;;  %4672 = vmatprep.mubr.msk.f32.mxu1 %vm429_vm1, %v1858_v28  ;;  %v1861_v36 = vmax.f32 %v1787_v31, 0.0 }
 0x410   :  { %v4624_v34 = vpop.f32.mrf.mxu0  ;;  %4673 = vmatmul.mubr.msk.f32.gmra.mxu1 %vm429_vm1, %v1859_v30 }
 0x411   :  { %v1860_v35 = vmax.f32 %v1782_v33, 0.0  ;;  %v1797_v37 = vadd.f32 %v4624_v34, %v5592_v29 }
 0x412   :  { %v1791_v38 = vpop.f32.mrf.mxu0 }
 0x413   :  { %v1792_v39 = vadd.f32 %v5592_v29, %v1791_v38  ;;  %4675 = vmatprep.mubr.msk.f32.mxu1 %vm429_vm1, %v1860_v35  ;;  %v1863_v43 = vmax.f32 %v1797_v37, 0.0 }
 0x414   :  { %v4627_v40 = vpop.f32.mrf.mxu0  ;;  %4676 = vmatmul.mubr.msk.f32.gmra.mxu1 %vm429_vm1, %v1861_v36 }
 0x415   :  { %v1862_v42 = vmax.f32 %v1792_v39, 0.0  ;;  %v1807_v44 = vadd.f32 %v4627_v40, %v5592_v29 }
 0x416   :  { %v1801_v45 = vpop.f32.mrf.mxu0 }
 0x417   :  { %v1802_v46 = vadd.f32 %v5592_v29, %v1801_v45  ;;  %4678 = vmatprep.mubr.msk.f32.mxu1 %vm429_vm1, %v1862_v42  ;;  %v1865_v49 = vmax.f32 %v1807_v44, 0.0 }
 0x418   :  { %v4630_v47 = vpop.f32.mrf.mxu0  ;;  %4679 = vmatmul.mubr.msk.f32.gmra.mxu1 %vm429_vm1, %v1863_v43 }
 0x419   :  { %v1864_v48 = vmax.f32 %v1802_v46, 0.0  ;;  %v1817_v50 = vadd.f32 %v4630_v47, %v5592_v29 }
 0x41a   :  { %v1811_v14 = vpop.f32.mrf.mxu0 }
 0x41b   :  { %v1812_v51 = vadd.f32 %v5592_v29, %v1811_v14  ;;  %4681 = vmatprep.mubr.msk.f32.mxu1 %vm429_vm1, %v1864_v48  ;;  %v1867_v55 = vmax.f32 %v1817_v50, 0.0 }
 0x41c   :  { %v4633_v53 = vpop.f32.mrf.mxu0  ;;  %4682 = vmatmul.mubr.msk.f32.gmra.mxu1 %vm429_vm1, %v1865_v49 }
 0x41d   :  { %v1866_v54 = vmax.f32 %v1812_v51, 0.0  ;;  %v1827_v56 = vadd.f32 %v4633_v53, %v5592_v29 }
 0x41e   :  { %v1821_v57 = vpop.f32.mrf.mxu0 }
 0x41f   :  { %v1822_v58 = vadd.f32 %v5592_v29, %v1821_v57  ;;  %4684 = vmatprep.mubr.msk.f32.mxu1 %vm429_vm1, %v1866_v54  ;;  %v1869_v61 = vmax.f32 %v1827_v56, 0.0 }
 0x420   :  { %v4636_v59 = vpop.f32.mrf.mxu0  ;;  %4685 = vmatmul.mubr.msk.f32.gmra.mxu1 %vm429_vm1, %v1867_v55 }
 0x421   :  { %v1868_v60 = vmax.f32 %v1822_v58, 0.0  ;;  %v1837_v26 = vadd.f32 %v4636_v59, %v5592_v29 }
 0x422   :  { %v1831_v62 = vpop.f32.mrf.mxu0 }
 0x423   :  { %v1832_v63 = vadd.f32 %v5592_v29, %v1831_v62  ;;  %4687 = vmatprep.mubr.msk.f32.mxu1 %vm429_vm1, %v1868_v60  ;;  %v1871_v1 = vmax.f32 %v1837_v26, 0.0 }
 0x424   :  { %4688 = vmatmul.mubr.msk.f32.gmra.mxu1 %vm429_vm1, %v1869_v61  ;;  %v4697_v2 = vpop.f32.mrf.mxu0 }
 0x425   :  { %v1870_v0 = vmax.f32 %v1832_v63, 0.0 }
 0x426   :  { %v2270_v29 = vpop.f32.mrf.mxu0 }
 0x427   :  { %4690 = vmatprep.mubr.msk.f32.mxu1 %vm429_vm1, %v1870_v0 }
 0x428   :  { %4691 = vmatmul.mubr.msk.f32.gmra.mxu1 %vm429_vm1, %v1871_v1  ;;  %v4700_v7 = vpop.f32.mrf.mxu0 }
 0x42a   :  { %v2280_v8 = vpop.f32.mrf.mxu0 }
 0x42c   :  { %v4703_v9 = vpop.f32.mrf.mxu0 }
 0x42e   :  { %v2290_v10 = vpop.f32.mrf.mxu0 }
 0x430   :  { %v4706_v11 = vpop.f32.mrf.mxu0 }
 0x432   :  { %v2300_v12 = vpop.f32.mrf.mxu0 }
 0x434   :  { %v4709_v41 = vpop.f32.mrf.mxu0 }
 0x436   :  { %v2310_v13 = vpop.f32.mrf.mxu0 }
 0x438   :  { %v5679_v15 = vpop.f32.mrf.mxu0 }
 0x43a   :  { %v5681_v16 = vpop.f32.mrf.mxu0 }
 0x43c   :  { %v5683_v17 = vpop.f32.mrf.mxu0 }
 0x43e   :  { %v5685_v18 = vpop.f32.mrf.mxu0 }
 0x440   :  { %v5687_v19 = vpop.f32.mrf.mxu0 }
 0x442   :  { %v5694_v22 = vpop.f32.mrf.mxu0 }
 0x444   :  { %v5698_v28 = vpop.f32.mrf.mxu0 }
 0x446   :  { %v5702_v38 = vpop.f32.mrf.mxu0 }
 0x448   :  { %v5708_v48 = vpop.f32.mrf.mxu0 }
 0x44a   :  { %v5714_v57 = vpop.f32.mrf.mxu0 }
 0x44c   :  { %v5720_v1 = vpop.f32.mrf.mxu0 }
 0x4ac   :  { %v4647_v21 = vpop.f32.mrf.mxu1 }
 0x4ad   :  { %v2050_v23 = vadd.f32 %v4647_v21, %v5692_v20 }
 0x4ae   :  { %v2044_v52 = vpop.f32.mrf.mxu1 }
 0x4af   :  { %v2045_v24 = vadd.f32 %v5692_v20, %v2044_v52  ;;  %v2430_v25 = vadd.f32 %v4697_v2, %v2050_v23 }
 0x4b0   :  { %v4650_v27 = vpop.f32.mrf.mxu1 }
 0x4b1   :  { %v2429_v30 = vadd.f32 %v2270_v29, %v2045_v24  ;;  %v2060_v31 = vadd.f32 %v4650_v27, %v5692_v20  ;;  %v2462_v35 = vmax.f32 %v2430_v25, 0.0 }
 0x4b2   :  { %v2054_v32 = vpop.f32.mrf.mxu1 }
 0x4b3   :  { %v2461_v33 = vmax.f32 %v2429_v30, 0.0  ;;  %v2055_v34 = vadd.f32 %v5692_v20, %v2054_v32  ;;  %v2432_v36 = vadd.f32 %v4700_v7, %v2060_v31 }
 0x4b4   :  { %v4653_v37 = vpop.f32.mrf.mxu1 }
 0x4b5   :  { %v2431_v39 = vadd.f32 %v2280_v8, %v2055_v34  ;;  %v2070_v40 = vadd.f32 %v4653_v37, %v5692_v20  ;;  %4751 = vmatprep.mubr.msk.f32.mxu1 %vm429_vm1, %v2461_v33  ;;  %v2464_v45 = vmax.f32 %v2432_v36, 0.0 }
 0x4b6   :  { %v2064_v42 = vpop.f32.mrf.mxu1  ;;  %4752 = vmatmul.mubr.msk.f32.vlgmr.msra.gmra.mxu1 %vm429_vm1, %v2462_v35 }
 0x4b7   :  { %v2463_v43 = vmax.f32 %v2431_v39, 0.0  ;;  %v2065_v44 = vadd.f32 %v5692_v20, %v2064_v42  ;;  %v2434_v46 = vadd.f32 %v4703_v9, %v2070_v40  ;;  %v2370_v9 = vpop.f32.mrf.mxu0 }
 0x4b8   :  { %v4656_v47 = vpop.f32.mrf.mxu1 }
 0x4b9   :  { %v2433_v49 = vadd.f32 %v2290_v10, %v2065_v44  ;;  %v2080_v50 = vadd.f32 %v4656_v47, %v5692_v20  ;;  %4754 = vmatprep.mubr.msk.f32.mxu1 %vm429_vm1, %v2463_v43  ;;  %v2466_v54 = vmax.f32 %v2434_v46, 0.0  ;;  %v4730_v24 = vpop.f32.mrf.mxu0 }
 0x4ba   :  { %v2074_v14 = vpop.f32.mrf.mxu1  ;;  %4755 = vmatmul.mubr.msk.f32.gmra.mxu1 %vm429_vm1, %v2464_v45 }
 0x4bb   :  { %v2465_v51 = vmax.f32 %v2433_v49, 0.0  ;;  %v2075_v53 = vadd.f32 %v5692_v20, %v2074_v14  ;;  %v2436_v55 = vadd.f32 %v4706_v11, %v2080_v50  ;;  %v2380_v34 = vpop.f32.mrf.mxu0 }
 0x4bc   :  { %v4659_v56 = vpop.f32.mrf.mxu1 }
 0x4bd   :  { %v2435_v58 = vadd.f32 %v2300_v12, %v2075_v53  ;;  %v2090_v59 = vadd.f32 %v4659_v56, %v5692_v20  ;;  %4757 = vmatprep.mubr.msk.f32.mxu1 %vm429_vm1, %v2465_v51  ;;  %v2468_v62 = vmax.f32 %v2436_v55, 0.0  ;;  %v4733_v43 = vpop.f32.mrf.mxu0 }
 0x4be   :  { %v2084_v60 = vpop.f32.mrf.mxu1  ;;  %4758 = vmatmul.mubr.msk.f32.gmra.mxu1 %vm429_vm1, %v2466_v54 }
 0x4bf   :  { %v2467_v61 = vmax.f32 %v2435_v58, 0.0  ;;  %v2085_v26 = vadd.f32 %v5692_v20, %v2084_v60  ;;  %v2438_v63 = vadd.f32 %v4709_v41, %v2090_v59  ;;  %v2390_v14 = vpop.f32.mrf.mxu0 }
 0x4c0   :  { %v4662_v0 = vpop.f32.mrf.mxu1 }
 0x4c1   :  { %v2437_v2 = vadd.f32 %v2310_v13, %v2085_v26  ;;  %v2100_v3 = vadd.f32 %v4662_v0, %v5692_v20  ;;  %4760 = vmatprep.mubr.msk.f32.mxu1 %vm429_vm1, %v2467_v61  ;;  %v2470_v6 = vmax.f32 %v2438_v63, 0.0  ;;  %v4736_v59 = vpop.f32.mrf.mxu0 }
 0x4c2   :  { %v2094_v4 = vpop.f32.mrf.mxu1  ;;  %4761 = vmatmul.mubr.msk.f32.gmra.mxu1 %vm429_vm1, %v2468_v62 }
 0x4c3   :  { %v2469_v29 = vmax.f32 %v2437_v2, 0.0  ;;  %v2095_v5 = vadd.f32 %v5692_v20, %v2094_v4  ;;  %v2440_v7 = vadd.f32 %v5679_v15, %v2100_v3  ;;  %v2400_v2 = vpop.f32.mrf.mxu0 }
 0x4c4   :  { %v4665_v8 = vpop.f32.mrf.mxu1 }
 0x4c5   :  { %v2439_v10 = vadd.f32 %v5681_v16, %v2095_v5  ;;  %v2110_v11 = vadd.f32 %v4665_v8, %v5692_v20  ;;  %4763 = vmatprep.mubr.msk.f32.mxu1 %vm429_vm1, %v2469_v29  ;;  %v2472_v21 = vmax.f32 %v2440_v7, 0.0 }
 0x4c6   :  { %v2104_v12 = vpop.f32.mrf.mxu1  ;;  %4764 = vmatmul.mubr.msk.f32.gmra.mxu1 %vm429_vm1, %v2470_v6 }
 0x4c7   :  { %v2471_v41 = vmax.f32 %v2439_v10, 0.0  ;;  %v2105_v13 = vadd.f32 %v5692_v20, %v2104_v12  ;;  %v2442_v23 = vadd.f32 %v5683_v17, %v2110_v11 }
 0x4c8   :  { %v4668_v52 = vpop.f32.mrf.mxu1 }
 0x4c9   :  { %v2441_v15 = vadd.f32 %v5685_v18, %v2105_v13  ;;  %v2120_v25 = vadd.f32 %v4668_v52, %v5692_v20  ;;  %4766 = vmatprep.mubr.msk.f32.mxu1 %vm429_vm1, %v2471_v41  ;;  %v2474_v31 = vmax.f32 %v2442_v23, 0.0 }
 0x4ca   :  { %v2114_v16 = vpop.f32.mrf.mxu1  ;;  %4767 = vmatmul.mubr.msk.f32.gmra.mxu1 %vm429_vm1, %v2472_v21 }
 0x4cb   :  { %v2473_v27 = vmax.f32 %v2441_v15, 0.0  ;;  %v2115_v30 = vadd.f32 %v5692_v20, %v2114_v16  ;;  %v2444_v32 = vadd.f32 %v5687_v19, %v2120_v25 }
 0x4cc   :  { %v4671_v33 = vpop.f32.mrf.mxu1 }
 0x4cd   :  { %v2443_v17 = vadd.f32 %v5694_v22, %v2115_v30  ;;  %v2130_v35 = vadd.f32 %v4671_v33, %v5692_v20  ;;  %4769 = vmatprep.mubr.msk.f32.mxu1 %vm429_vm1, %v2473_v27  ;;  %v2476_v39 = vmax.f32 %v2444_v32, 0.0 }
 0x4ce   :  { %v2124_v18 = vpop.f32.mrf.mxu1  ;;  %4770 = vmatmul.mubr.msk.f32.gmra.mxu1 %vm429_vm1, %v2474_v31 }
 0x4cf   :  { %v2475_v36 = vmax.f32 %v2443_v17, 0.0  ;;  %v2125_v37 = vadd.f32 %v5692_v20, %v2124_v18  ;;  %v2446_v40 = vadd.f32 %v5698_v28, %v2130_v35 }
 0x4d0   :  { %v4674_v42 = vpop.f32.mrf.mxu1 }
 0x4d1   :  { %v2445_v19 = vadd.f32 %v5702_v38, %v2125_v37  ;;  %v2140_v44 = vadd.f32 %v4674_v42, %v5692_v20  ;;  %4772 = vmatprep.mubr.msk.f32.mxu1 %vm429_vm1, %v2475_v36  ;;  %v2478_v47 = vmax.f32 %v2446_v40, 0.0 }
 0x4d2   :  { %v2134_v22 = vpop.f32.mrf.mxu1  ;;  %4773 = vmatmul.mubr.msk.f32.gmra.mxu1 %vm429_vm1, %v2476_v39 }
 0x4d3   :  { %v2477_v45 = vmax.f32 %v2445_v19, 0.0  ;;  %v2135_v46 = vadd.f32 %v5692_v20, %v2134_v22  ;;  %v2448_v49 = vadd.f32 %v5708_v48, %v2140_v44  ;;  %v3254_v22 = vld [vmem:[%s6229_s5 + $0x18] sm:$0xff] }
 0x4d4   :  { %v4677_v50 = vpop.f32.mrf.mxu1  ;;  %4855 = vmatprep.subr.mxu1 %v3254_v22 }
 0x4d5   :  { %v2447_v28 = vadd.f32 %v5714_v57, %v2135_v46  ;;  %v2150_v51 = vadd.f32 %v4677_v50, %v5692_v20  ;;  %4775 = vmatprep.mubr.msk.f32.mxu1 %vm429_vm1, %v2477_v45  ;;  %v2480_v55 = vmax.f32 %v2448_v49, 0.0  ;;  %4856 = vmatpush3.msra.mxu1 %v3254_v22  ;;  %v3252_v45 = vld [vmem:[%s6229_s5 + $0x8] sm:$0xff]  ;;  %v3251_v46 = vld [vmem:[%s6229_s5] sm:$0xff] }
 0x4d6   :  { %v2144_v38 = vpop.f32.mrf.mxu1  ;;  %4776 = vmatmul.mubr.msk.f32.gmra.mxu1 %vm429_vm1, %v2478_v47  ;;  %v5796_v47 = vld [vmem:[%s6227_s4 + $0x6] ss:$0 sm:$0xff] }
 0x4d7   :  { %v2479_v53 = vmax.f32 %v2447_v28, 0.0  ;;  %v2145_v54 = vadd.f32 %v5692_v20, %v2144_v38  ;;  %v2450_v56 = vadd.f32 %v5720_v1, %v2150_v51 }
 0x4d8   :  { %v4680_v58 = vpop.f32.mrf.mxu1 }
 0x4d9   :  { %v2449_v48 = vadd.f32 %v2370_v9, %v2145_v54  ;;  %v2160_v60 = vadd.f32 %v4680_v58, %v5692_v20  ;;  %4778 = vmatprep.mubr.msk.f32.mxu1 %vm429_vm1, %v2479_v53  ;;  %v2482_v62 = vmax.f32 %v2450_v56, 0.0  ;;  %v4739_v9 = vpop.f32.mrf.mxu0 }
 0x4da   :  { %v2154_v57 = vpop.f32.mrf.mxu1  ;;  %4779 = vmatmul.mubr.msk.f32.gmra.mxu1 %vm429_vm1, %v2480_v55 }
 0x4db   :  { %v2481_v61 = vmax.f32 %v2449_v48, 0.0  ;;  %v2155_v26 = vadd.f32 %v5692_v20, %v2154_v57  ;;  %v2452_v63 = vadd.f32 %v4730_v24, %v2160_v60  ;;  %v2410_v24 = vpop.f32.mrf.mxu0 }
 0x4dc   :  { %v4683_v0 = vpop.f32.mrf.mxu1 }
 0x4dd   :  { %v2451_v3 = vadd.f32 %v2380_v34, %v2155_v26  ;;  %v2170_v1 = vadd.f32 %v4683_v0, %v5692_v20  ;;  %4781 = vmatprep.mubr.msk.f32.mxu1 %vm429_vm1, %v2481_v61  ;;  %v2484_v6 = vmax.f32 %v2452_v63, 0.0  ;;  %v4742_v34 = vpop.f32.mrf.mxu0 }
 0x4de   :  { %v2164_v4 = vpop.f32.mrf.mxu1  ;;  %4782 = vmatmul.mubr.msk.f32.gmra.mxu1 %vm429_vm1, %v2482_v62 }
 0x4df   :  { %v2483_v29 = vmax.f32 %v2451_v3, 0.0  ;;  %v2165_v5 = vadd.f32 %v5692_v20, %v2164_v4  ;;  %v2454_v7 = vadd.f32 %v4733_v43, %v2170_v1  ;;  %v2420_v42 = vpop.f32.mrf.mxu0 }
 0x4e0   :  { %v4686_v8 = vpop.f32.mrf.mxu1 }
 0x4e1   :  { %v2453_v10 = vadd.f32 %v2390_v14, %v2165_v5  ;;  %v2180_v11 = vadd.f32 %v4686_v8, %v5692_v20  ;;  %4784 = vmatprep.mubr.msk.f32.mxu1 %vm429_vm1, %v2483_v29  ;;  %v2486_v21 = vmax.f32 %v2454_v7, 0.0 }
 0x4e2   :  { %v2174_v12 = vpop.f32.mrf.mxu1  ;;  %4785 = vmatmul.mubr.msk.f32.gmra.mxu1 %vm429_vm1, %v2484_v6 }
 0x4e3   :  { %v2485_v41 = vmax.f32 %v2453_v10, 0.0  ;;  %v2175_v13 = vadd.f32 %v5692_v20, %v2174_v12  ;;  %v2456_v23 = vadd.f32 %v4736_v59, %v2180_v11 }
 0x4e4   :  { %v4689_v52 = vpop.f32.mrf.mxu1 }
 0x4e5   :  { %v2455_v15 = vadd.f32 %v2400_v2, %v2175_v13  ;;  %v2190_v25 = vadd.f32 %v4689_v52, %v5692_v20  ;;  %4787 = vmatprep.mubr.msk.f32.mxu1 %vm429_vm1, %v2485_v41  ;;  %v2488_v31 = vmax.f32 %v2456_v23, 0.0 }
 0x4e6   :  { %v2184_v16 = vpop.f32.mrf.mxu1  ;;  %4788 = vmatmul.mubr.msk.f32.gmra.mxu1 %vm429_vm1, %v2486_v21 }
 0x4e7   :  { %v2487_v27 = vmax.f32 %v2455_v15, 0.0  ;;  %v2185_v30 = vadd.f32 %v5692_v20, %v2184_v16  ;;  %v2458_v32 = vadd.f32 %v4739_v9, %v2190_v25 }
 0x4e8   :  { %v4692_v33 = vpop.f32.mrf.mxu1 }
 0x4e9   :  { %v2457_v17 = vadd.f32 %v2410_v24, %v2185_v30  ;;  %v2200_v35 = vadd.f32 %v4692_v33, %v5692_v20  ;;  %4790 = vmatprep.mubr.msk.f32.mxu1 %vm429_vm1, %v2487_v27  ;;  %v2490_v39 = vmax.f32 %v2458_v32, 0.0 }
 0x4ea   :  { %v2194_v18 = vpop.f32.mrf.mxu1  ;;  %4791 = vmatmul.mubr.msk.f32.gmra.mxu1 %vm429_vm1, %v2488_v31 }
 0x4eb   :  { %v2489_v36 = vmax.f32 %v2457_v17, 0.0  ;;  %v2195_v37 = vadd.f32 %v5692_v20, %v2194_v18  ;;  %v2460_v40 = vadd.f32 %v4742_v34, %v2200_v35  ;;  %v3253_v20 = vld [vmem:[%s6229_s5 + $0x10] sm:$0xff] }
 0x4ec   :  { %4857 = vmatprep.subr.mxu1 %v3253_v20 }
 0x4ed   :  { %v2459_v43 = vadd.f32 %v2420_v42, %v2195_v37  ;;  %4793 = vmatprep.mubr.msk.f32.mxu1 %vm429_vm1, %v2489_v36  ;;  %v2492_v44 = vmax.f32 %v2460_v40, 0.0  ;;  %4858 = vmatpush3.msra.mxu1 %v3253_v20 }
 0x4ee   :  { %4794 = vmatmul.mubr.msk.f32.gmra.mxu1 %vm429_vm1, %v2490_v39  ;;  %4859 = vmatprep.subr.mxu1 %v3252_v45 }
 0x4ef   :  { %v2491_v19 = vmax.f32 %v2459_v43, 0.0  ;;  %4860 = vmatpush3.msra.mxu1 %v3252_v45 }
 0x4f0   :  { %4861 = vmatprep.subr.mxu1 %v3251_v46 }
 0x4f1   :  { %4796 = vmatprep.mubr.msk.f32.mxu1 %vm429_vm1, %v2491_v19  ;;  %4862 = vmatpush3.msra.mxu1 %v3251_v46 }
 0x4f2   :  { %4797 = vmatmul.mubr.msk.f32.gmra.mxu1 %vm429_vm1, %v2492_v44 }
 0x576   :  { %v4753_v49 = vpop.f32.mrf.mxu1 }
 0x577   :  { %v2671_v50 = vadd.f32 %v4753_v49, %v5796_v47 }
 0x578   :  { %v2665_v14 = vpop.f32.mrf.mxu1 }
 0x579   :  { %v2666_v28 = vadd.f32 %v5796_v47, %v2665_v14  ;;  %v2825_v53 = vmax.f32 %v2671_v50, 0.0 }
 0x57a   :  { %v4756_v51 = vpop.f32.mrf.mxu1 }
 0x57b   :  { %v2824_v38 = vmax.f32 %v2666_v28, 0.0  ;;  %v2681_v54 = vadd.f32 %v4756_v51, %v5796_v47 }
 0x57c   :  { %v2675_v55 = vpop.f32.mrf.mxu1 }
 0x57d   :  { %v2676_v56 = vadd.f32 %v5796_v47, %v2675_v55  ;;  %4807 = vmatprep.mubr.msk.f32.mxu0 %vm429_vm1, %v2824_v38  ;;  %v2827_v48 = vmax.f32 %v2681_v54, 0.0 }
 0x57e   :  { %v4759_v58 = vpop.f32.mrf.mxu1  ;;  %4808 = vmatmul.mubr.msk.f32.vlgmr.msra.gmra.mxu0 %vm429_vm1, %v2825_v53 }
 0x57f   :  { %v2826_v59 = vmax.f32 %v2676_v56, 0.0  ;;  %v2691_v60 = vadd.f32 %v4759_v58, %v5796_v47 }
 0x580   :  { %v2685_v57 = vpop.f32.mrf.mxu1 }
 0x581   :  { %v2686_v61 = vadd.f32 %v5796_v47, %v2685_v57  ;;  %4810 = vmatprep.mubr.msk.f32.mxu0 %vm429_vm1, %v2826_v59  ;;  %v2829_v63 = vmax.f32 %v2691_v60, 0.0 }
 0x582   :  { %v4762_v26 = vpop.f32.mrf.mxu1  ;;  %4811 = vmatmul.mubr.msk.f32.gmra.mxu0 %vm429_vm1, %v2827_v48 }
 0x583   :  { %v2828_v62 = vmax.f32 %v2686_v61, 0.0  ;;  %v2701_v0 = vadd.f32 %v4762_v26, %v5796_v47 }
 0x584   :  { %v2695_v2 = vpop.f32.mrf.mxu1 }
 0x585   :  { %v2696_v3 = vadd.f32 %v5796_v47, %v2695_v2  ;;  %4813 = vmatprep.mubr.msk.f32.mxu0 %vm429_vm1, %v2828_v62  ;;  %v2831_v29 = vmax.f32 %v2701_v0, 0.0 }
 0x586   :  { %v4765_v1 = vpop.f32.mrf.mxu1  ;;  %4814 = vmatmul.mubr.msk.f32.gmra.mxu0 %vm429_vm1, %v2829_v63 }
 0x587   :  { %v2830_v4 = vmax.f32 %v2696_v3, 0.0  ;;  %v2711_v5 = vadd.f32 %v4765_v1, %v5796_v47 }
 0x588   :  { %v2705_v6 = vpop.f32.mrf.mxu1 }
 0x589   :  { %v2706_v7 = vadd.f32 %v5796_v47, %v2705_v6  ;;  %4816 = vmatprep.mubr.msk.f32.mxu0 %vm429_vm1, %v2830_v4  ;;  %v2833_v10 = vmax.f32 %v2711_v5, 0.0 }
 0x58a   :  { %v4768_v8 = vpop.f32.mrf.mxu1  ;;  %4817 = vmatmul.mubr.msk.f32.gmra.mxu0 %vm429_vm1, %v2831_v29 }
 0x58b   :  { %v2832_v9 = vmax.f32 %v2706_v7, 0.0  ;;  %v2721_v11 = vadd.f32 %v4768_v8, %v5796_v47 }
 0x58c   :  { %v2715_v12 = vpop.f32.mrf.mxu1 }
 0x58d   :  { %v2716_v41 = vadd.f32 %v5796_v47, %v2715_v12  ;;  %4819 = vmatprep.mubr.msk.f32.mxu0 %vm429_vm1, %v2832_v9  ;;  %v2835_v23 = vmax.f32 %v2721_v11, 0.0 }
 0x58e   :  { %v4771_v13 = vpop.f32.mrf.mxu1  ;;  %4820 = vmatmul.mubr.msk.f32.gmra.mxu0 %vm429_vm1, %v2833_v10 }
 0x58f   :  { %v2834_v21 = vmax.f32 %v2716_v41, 0.0  ;;  %v2731_v52 = vadd.f32 %v4771_v13, %v5796_v47  ;;  %v5865_v41 = vld [vmem:[%s6227_s4 + $0x7] ss:$0 sm:$0xff] }
 0x590   :  { %v2725_v24 = vpop.f32.mrf.mxu1 }
 0x591   :  { %v2726_v15 = vadd.f32 %v5796_v47, %v2725_v24  ;;  %4822 = vmatprep.mubr.msk.f32.mxu0 %vm429_vm1, %v2834_v21  ;;  %v2837_v27 = vmax.f32 %v2731_v52, 0.0 }
 0x592   :  { %v4774_v25 = vpop.f32.mrf.mxu1  ;;  %4823 = vmatmul.mubr.msk.f32.gmra.mxu0 %vm429_vm1, %v2835_v23 }
 0x593   :  { %v2836_v16 = vmax.f32 %v2726_v15, 0.0  ;;  %v2741_v30 = vadd.f32 %v4774_v25, %v5796_v47 }
 0x594   :  { %v2735_v31 = vpop.f32.mrf.mxu1 }
 0x595   :  { %v2736_v32 = vadd.f32 %v5796_v47, %v2735_v31  ;;  %4825 = vmatprep.mubr.msk.f32.mxu0 %vm429_vm1, %v2836_v16  ;;  %v2839_v17 = vmax.f32 %v2741_v30, 0.0 }
 0x596   :  { %v4777_v33 = vpop.f32.mrf.mxu1  ;;  %4826 = vmatmul.mubr.msk.f32.gmra.mxu0 %vm429_vm1, %v2837_v27 }
 0x597   :  { %v2838_v34 = vmax.f32 %v2736_v32, 0.0  ;;  %v2751_v35 = vadd.f32 %v4777_v33, %v5796_v47 }
 0x598   :  { %v2745_v18 = vpop.f32.mrf.mxu1 }
 0x599   :  { %v2746_v36 = vadd.f32 %v5796_v47, %v2745_v18  ;;  %4828 = vmatprep.mubr.msk.f32.mxu0 %vm429_vm1, %v2838_v34  ;;  %v2841_v40 = vmax.f32 %v2751_v35, 0.0 }
 0x59a   :  { %v4780_v37 = vpop.f32.mrf.mxu1  ;;  %4829 = vmatmul.mubr.msk.f32.gmra.mxu0 %vm429_vm1, %v2839_v17 }
 0x59b   :  { %v2840_v39 = vmax.f32 %v2746_v36, 0.0  ;;  %v2761_v42 = vadd.f32 %v4780_v37, %v5796_v47 }
 0x59c   :  { %v2755_v43 = vpop.f32.mrf.mxu1 }
 0x59d   :  { %v2756_v19 = vadd.f32 %v5796_v47, %v2755_v43  ;;  %4831 = vmatprep.mubr.msk.f32.mxu0 %vm429_vm1, %v2840_v39  ;;  %v2843_v20 = vmax.f32 %v2761_v42, 0.0 }
 0x59e   :  { %v4783_v44 = vpop.f32.mrf.mxu1  ;;  %4832 = vmatmul.mubr.msk.f32.gmra.mxu0 %vm429_vm1, %v2841_v40 }
 0x59f   :  { %v2842_v22 = vmax.f32 %v2756_v19, 0.0  ;;  %v2771_v45 = vadd.f32 %v4783_v44, %v5796_v47 }
 0x5a0   :  { %v2765_v46 = vpop.f32.mrf.mxu1 }
 0x5a1   :  { %v2766_v49 = vadd.f32 %v5796_v47, %v2765_v46  ;;  %4834 = vmatprep.mubr.msk.f32.mxu0 %vm429_vm1, %v2842_v22  ;;  %v2845_v28 = vmax.f32 %v2771_v45, 0.0 }
 0x5a2   :  { %v4786_v50 = vpop.f32.mrf.mxu1  ;;  %4835 = vmatmul.mubr.msk.f32.gmra.mxu0 %vm429_vm1, %v2843_v20 }
 0x5a3   :  { %v2844_v14 = vmax.f32 %v2766_v49, 0.0  ;;  %v2781_v51 = vadd.f32 %v4786_v50, %v5796_v47 }
 0x5a4   :  { %v2775_v38 = vpop.f32.mrf.mxu1 }
 0x5a5   :  { %v2776_v53 = vadd.f32 %v5796_v47, %v2775_v38  ;;  %4837 = vmatprep.mubr.msk.f32.mxu0 %vm429_vm1, %v2844_v14  ;;  %v2847_v56 = vmax.f32 %v2781_v51, 0.0 }
 0x5a6   :  { %v4789_v54 = vpop.f32.mrf.mxu1  ;;  %4838 = vmatmul.mubr.msk.f32.gmra.mxu0 %vm429_vm1, %v2845_v28 }
 0x5a7   :  { %v2846_v55 = vmax.f32 %v2776_v53, 0.0  ;;  %v2791_v58 = vadd.f32 %v4789_v54, %v5796_v47 }
 0x5a8   :  { %v2785_v59 = vpop.f32.mrf.mxu1 }
 0x5a9   :  { %v2786_v48 = vadd.f32 %v5796_v47, %v2785_v59  ;;  %4840 = vmatprep.mubr.msk.f32.mxu0 %vm429_vm1, %v2846_v55  ;;  %v2849_v61 = vmax.f32 %v2791_v58, 0.0 }
 0x5aa   :  { %v4792_v60 = vpop.f32.mrf.mxu1  ;;  %4841 = vmatmul.mubr.msk.f32.gmra.mxu0 %vm429_vm1, %v2847_v56 }
 0x5ab   :  { %v2848_v57 = vmax.f32 %v2786_v48, 0.0  ;;  %v2801_v26 = vadd.f32 %v4792_v60, %v5796_v47 }
 0x5ac   :  { %v2795_v62 = vpop.f32.mrf.mxu1 }
 0x5ad   :  { %v2796_v63 = vadd.f32 %v5796_v47, %v2795_v62  ;;  %4843 = vmatprep.mubr.msk.f32.mxu0 %vm429_vm1, %v2848_v57  ;;  %v2851_v3 = vmax.f32 %v2801_v26, 0.0 }
 0x5ae   :  { %v4795_v0 = vpop.f32.mrf.mxu1  ;;  %4844 = vmatmul.mubr.msk.f32.gmra.mxu0 %vm429_vm1, %v2849_v61 }
 0x5af   :  { %v2850_v2 = vmax.f32 %v2796_v63, 0.0  ;;  %v2811_v1 = vadd.f32 %v4795_v0, %v5796_v47 }
 0x5b0   :  { %v2805_v4 = vpop.f32.mrf.mxu1 }
 0x5b1   :  { %v2806_v29 = vadd.f32 %v5796_v47, %v2805_v4  ;;  %4846 = vmatprep.mubr.msk.f32.mxu0 %vm429_vm1, %v2850_v2  ;;  %v2853_v7 = vmax.f32 %v2811_v1, 0.0 }
 0x5b2   :  { %v4798_v5 = vpop.f32.mrf.mxu1  ;;  %4847 = vmatmul.mubr.msk.f32.gmra.mxu0 %vm429_vm1, %v2851_v3 }
 0x5b3   :  { %v2852_v6 = vmax.f32 %v2806_v29, 0.0  ;;  %v2821_v8 = vadd.f32 %v4798_v5, %v5796_v47 }
 0x5b4   :  { %v2815_v9 = vpop.f32.mrf.mxu1 }
 0x5b5   :  { %v2816_v10 = vadd.f32 %v5796_v47, %v2815_v9  ;;  %4849 = vmatprep.mubr.msk.f32.mxu0 %vm429_vm1, %v2852_v6  ;;  %v2855_v12 = vmax.f32 %v2821_v8, 0.0 }
 0x5b6   :  { %4850 = vmatmul.mubr.msk.f32.gmra.mxu0 %vm429_vm1, %v2853_v7 }
 0x5b7   :  { %v2854_v11 = vmax.f32 %v2816_v10, 0.0 }
 0x5b9   :  { %4852 = vmatprep.mubr.msk.f32.mxu0 %vm429_vm1, %v2854_v11 }
 0x5ba   :  { %4853 = vmatmul.mubr.msk.f32.gmra.mxu0 %vm429_vm1, %v2855_v12 }
 0x63e   :  { %v4809_v13 = vpop.f32.mrf.mxu0 }
 0x63f   :  { %v3034_v21 = vadd.f32 %v4809_v13, %v5865_v41 }
 0x640   :  { %v3028_v23 = vpop.f32.mrf.mxu0 }
 0x641   :  { %v3188_v47 = vmax.f32 %v3034_v21, 0.0  ;;  %v3029_v52 = vadd.f32 %v5865_v41, %v3028_v23 }
 0x642   :  { %v4812_v24 = vpop.f32.mrf.mxu0 }
 0x643   :  { %3220 = vst.msk [vmem:[%s6230_s8 + $0x8] sm:$0xff] %vm429_vm1, %v3188_v47  ;;  %v3187_v15 = vmax.f32 %v3029_v52, 0.0  ;;  %v3044_v25 = vadd.f32 %v4812_v24, %v5865_v41 }
 0x644   :  { %v3038_v16 = vpop.f32.mrf.mxu0 }
 0x645   :  { %3219 = vst.msk [vmem:[%s6230_s8] sm:$0xff] %vm429_vm1, %v3187_v15  ;;  %v3190_v27 = vmax.f32 %v3044_v25, 0.0  ;;  %v3039_v30 = vadd.f32 %v5865_v41, %v3038_v16  ;;  %4863 = vmatprep.mubr.msk.f32.mxu1 %vm429_vm1, %v3187_v15 }
 0x646   :  { %v4815_v31 = vpop.f32.mrf.mxu0  ;;  %4864 = vmatmul.mubr.msk.f32.vlgmr.msra.gmra.mxu1 %vm429_vm1, %v3188_v47 }
 0x647   :  { %3222 = vst.msk [vmem:[%s6230_s8 + $0x18] sm:$0xff] %vm429_vm1, %v3190_v27  ;;  %v3189_v32 = vmax.f32 %v3039_v30, 0.0  ;;  %v3054_v33 = vadd.f32 %v4815_v31, %v5865_v41 }
 0x648   :  { %v3048_v34 = vpop.f32.mrf.mxu0 }
 0x649   :  { %3221 = vst.msk [vmem:[%s6230_s8 + $0x10] sm:$0xff] %vm429_vm1, %v3189_v32  ;;  %v3192_v17 = vmax.f32 %v3054_v33, 0.0  ;;  %v3049_v35 = vadd.f32 %v5865_v41, %v3048_v34  ;;  %4866 = vmatprep.mubr.msk.f32.mxu1 %vm429_vm1, %v3189_v32 }
 0x64a   :  { %v4818_v18 = vpop.f32.mrf.mxu0  ;;  %4867 = vmatmul.mubr.msk.f32.gmra.mxu1 %vm429_vm1, %v3190_v27 }
 0x64b   :  { %3224 = vst.msk [vmem:[%s6230_s8 + $0x28] sm:$0xff] %vm429_vm1, %v3192_v17  ;;  %v3191_v36 = vmax.f32 %v3049_v35, 0.0  ;;  %v3064_v37 = vadd.f32 %v4818_v18, %v5865_v41 }
 0x64c   :  { %v3058_v39 = vpop.f32.mrf.mxu0 }
 0x64d   :  { %3223 = vst.msk [vmem:[%s6230_s8 + $0x20] sm:$0xff] %vm429_vm1, %v3191_v36  ;;  %v3194_v40 = vmax.f32 %v3064_v37, 0.0  ;;  %v3059_v42 = vadd.f32 %v5865_v41, %v3058_v39  ;;  %4869 = vmatprep.mubr.msk.f32.mxu1 %vm429_vm1, %v3191_v36 }
 0x64e   :  { %v4821_v43 = vpop.f32.mrf.mxu0  ;;  %4870 = vmatmul.mubr.msk.f32.gmra.mxu1 %vm429_vm1, %v3192_v17 }
 0x64f   :  { %3226 = vst.msk [vmem:[%s6230_s8 + $0x38] sm:$0xff] %vm429_vm1, %v3194_v40  ;;  %v3193_v19 = vmax.f32 %v3059_v42, 0.0  ;;  %v3074_v44 = vadd.f32 %v4821_v43, %v5865_v41 }
 0x650   :  { %v3068_v22 = vpop.f32.mrf.mxu0 }
 0x651   :  { %3225 = vst.msk [vmem:[%s6230_s8 + $0x30] sm:$0xff] %vm429_vm1, %v3193_v19  ;;  %v3196_v20 = vmax.f32 %v3074_v44, 0.0  ;;  %v3069_v45 = vadd.f32 %v5865_v41, %v3068_v22  ;;  %4872 = vmatprep.mubr.msk.f32.mxu1 %vm429_vm1, %v3193_v19 }
 0x652   :  { %v4824_v46 = vpop.f32.mrf.mxu0  ;;  %4873 = vmatmul.mubr.msk.f32.gmra.mxu1 %vm429_vm1, %v3194_v40 }
 0x653   :  { %3228 = vst.msk [vmem:[%s6230_s8 + $0x48] sm:$0xff] %vm429_vm1, %v3196_v20  ;;  %v3195_v49 = vmax.f32 %v3069_v45, 0.0  ;;  %v3084_v50 = vadd.f32 %v4824_v46, %v5865_v41 }
 0x654   :  { %v3078_v14 = vpop.f32.mrf.mxu0 }
 0x655   :  { %3227 = vst.msk [vmem:[%s6230_s8 + $0x40] sm:$0xff] %vm429_vm1, %v3195_v49  ;;  %v3198_v28 = vmax.f32 %v3084_v50, 0.0  ;;  %v3079_v51 = vadd.f32 %v5865_v41, %v3078_v14  ;;  %4875 = vmatprep.mubr.msk.f32.mxu1 %vm429_vm1, %v3195_v49 }
 0x656   :  { %v4827_v38 = vpop.f32.mrf.mxu0  ;;  %4876 = vmatmul.mubr.msk.f32.gmra.mxu1 %vm429_vm1, %v3196_v20 }
 0x657   :  { %3230 = vst.msk [vmem:[%s6230_s8 + $0x58] sm:$0xff] %vm429_vm1, %v3198_v28  ;;  %v3197_v53 = vmax.f32 %v3079_v51, 0.0  ;;  %v3094_v54 = vadd.f32 %v4827_v38, %v5865_v41 }
 0x658   :  { %v3088_v55 = vpop.f32.mrf.mxu0 }
 0x659   :  { %3229 = vst.msk [vmem:[%s6230_s8 + $0x50] sm:$0xff] %vm429_vm1, %v3197_v53  ;;  %v3200_v56 = vmax.f32 %v3094_v54, 0.0  ;;  %v3089_v58 = vadd.f32 %v5865_v41, %v3088_v55  ;;  %4878 = vmatprep.mubr.msk.f32.mxu1 %vm429_vm1, %v3197_v53 }
 0x65a   :  { %v4830_v59 = vpop.f32.mrf.mxu0  ;;  %4879 = vmatmul.mubr.msk.f32.gmra.mxu1 %vm429_vm1, %v3198_v28 }
 0x65b   :  { %3232 = vst.msk [vmem:[%s6230_s8 + $0x68] sm:$0xff] %vm429_vm1, %v3200_v56  ;;  %v3199_v48 = vmax.f32 %v3089_v58, 0.0  ;;  %v3104_v60 = vadd.f32 %v4830_v59, %v5865_v41 }
 0x65c   :  { %v3098_v57 = vpop.f32.mrf.mxu0 }
 0x65d   :  { %3231 = vst.msk [vmem:[%s6230_s8 + $0x60] sm:$0xff] %vm429_vm1, %v3199_v48  ;;  %v3202_v61 = vmax.f32 %v3104_v60, 0.0  ;;  %v3099_v26 = vadd.f32 %v5865_v41, %v3098_v57  ;;  %4881 = vmatprep.mubr.msk.f32.mxu1 %vm429_vm1, %v3199_v48 }
 0x65e   :  { %v4833_v62 = vpop.f32.mrf.mxu0  ;;  %4882 = vmatmul.mubr.msk.f32.gmra.mxu1 %vm429_vm1, %v3200_v56 }
 0x65f   :  { %3234 = vst.msk [vmem:[%s6230_s8 + $0x78] sm:$0xff] %vm429_vm1, %v3202_v61  ;;  %v3201_v63 = vmax.f32 %v3099_v26, 0.0  ;;  %v3114_v0 = vadd.f32 %v4833_v62, %v5865_v41 }
 0x660   :  { %v3108_v2 = vpop.f32.mrf.mxu0 }
 0x661   :  { %3233 = vst.msk [vmem:[%s6230_s8 + $0x70] sm:$0xff] %vm429_vm1, %v3201_v63  ;;  %v3204_v3 = vmax.f32 %v3114_v0, 0.0  ;;  %v3109_v1 = vadd.f32 %v5865_v41, %v3108_v2  ;;  %4884 = vmatprep.mubr.msk.f32.mxu1 %vm429_vm1, %v3201_v63 }
 0x662   :  { %v4836_v4 = vpop.f32.mrf.mxu0  ;;  %4885 = vmatmul.mubr.msk.f32.gmra.mxu1 %vm429_vm1, %v3202_v61 }
 0x663   :  { %3236 = vst.msk [vmem:[%s6230_s8 + $0x88] sm:$0xff] %vm429_vm1, %v3204_v3  ;;  %v3203_v29 = vmax.f32 %v3109_v1, 0.0  ;;  %v3124_v5 = vadd.f32 %v4836_v4, %v5865_v41 }
 0x664   :  { %v3118_v6 = vpop.f32.mrf.mxu0 }
 0x665   :  { %3235 = vst.msk [vmem:[%s6230_s8 + $0x80] sm:$0xff] %vm429_vm1, %v3203_v29  ;;  %v3206_v7 = vmax.f32 %v3124_v5, 0.0  ;;  %v3119_v8 = vadd.f32 %v5865_v41, %v3118_v6  ;;  %4887 = vmatprep.mubr.msk.f32.mxu1 %vm429_vm1, %v3203_v29 }
 0x666   :  { %v4839_v9 = vpop.f32.mrf.mxu0  ;;  %4888 = vmatmul.mubr.msk.f32.gmra.mxu1 %vm429_vm1, %v3204_v3 }
 0x667   :  { %3238 = vst.msk [vmem:[%s6230_s8 + $0x98] sm:$0xff] %vm429_vm1, %v3206_v7  ;;  %v3205_v10 = vmax.f32 %v3119_v8, 0.0  ;;  %v3134_v11 = vadd.f32 %v4839_v9, %v5865_v41 }
 0x668   :  { %v3128_v12 = vpop.f32.mrf.mxu0 }
 0x669   :  { %3237 = vst.msk [vmem:[%s6230_s8 + $0x90] sm:$0xff] %vm429_vm1, %v3205_v10  ;;  %v3208_v13 = vmax.f32 %v3134_v11, 0.0  ;;  %v3129_v21 = vadd.f32 %v5865_v41, %v3128_v12  ;;  %4890 = vmatprep.mubr.msk.f32.mxu1 %vm429_vm1, %v3205_v10 }
 0x66a   :  { %v4842_v23 = vpop.f32.mrf.mxu0  ;;  %4891 = vmatmul.mubr.msk.f32.gmra.mxu1 %vm429_vm1, %v3206_v7 }
 0x66b   :  { %3240 = vst.msk [vmem:[%s6230_s8 + $0xa8] sm:$0xff] %vm429_vm1, %v3208_v13  ;;  %v3207_v47 = vmax.f32 %v3129_v21, 0.0  ;;  %v3144_v52 = vadd.f32 %v4842_v23, %v5865_v41 }
 0x66c   :  { %v3138_v24 = vpop.f32.mrf.mxu0 }
 0x66d   :  { %3239 = vst.msk [vmem:[%s6230_s8 + $0xa0] sm:$0xff] %vm429_vm1, %v3207_v47  ;;  %v3210_v15 = vmax.f32 %v3144_v52, 0.0  ;;  %v3139_v25 = vadd.f32 %v5865_v41, %v3138_v24  ;;  %4893 = vmatprep.mubr.msk.f32.mxu1 %vm429_vm1, %v3207_v47 }
 0x66e   :  { %v4845_v16 = vpop.f32.mrf.mxu0  ;;  %4894 = vmatmul.mubr.msk.f32.gmra.mxu1 %vm429_vm1, %v3208_v13 }
 0x66f   :  { %3242 = vst.msk [vmem:[%s6230_s8 + $0xb8] sm:$0xff] %vm429_vm1, %v3210_v15  ;;  %v3209_v27 = vmax.f32 %v3139_v25, 0.0  ;;  %v3154_v30 = vadd.f32 %v4845_v16, %v5865_v41 }
 0x670   :  { %v3148_v31 = vpop.f32.mrf.mxu0 }
 0x671   :  { %3241 = vst.msk [vmem:[%s6230_s8 + $0xb0] sm:$0xff] %vm429_vm1, %v3209_v27  ;;  %v3212_v32 = vmax.f32 %v3154_v30, 0.0  ;;  %v3149_v33 = vadd.f32 %v5865_v41, %v3148_v31  ;;  %4896 = vmatprep.mubr.msk.f32.mxu1 %vm429_vm1, %v3209_v27 }
 0x672   :  { %v4848_v34 = vpop.f32.mrf.mxu0  ;;  %4897 = vmatmul.mubr.msk.f32.gmra.mxu1 %vm429_vm1, %v3210_v15 }
 0x673   :  { %3244 = vst.msk [vmem:[%s6230_s8 + $0xc8] sm:$0xff] %vm429_vm1, %v3212_v32  ;;  %v3211_v17 = vmax.f32 %v3149_v33, 0.0  ;;  %v3164_v35 = vadd.f32 %v4848_v34, %v5865_v41 }
 0x674   :  { %v3158_v18 = vpop.f32.mrf.mxu0 }
 0x675   :  { %3243 = vst.msk [vmem:[%s6230_s8 + $0xc0] sm:$0xff] %vm429_vm1, %v3211_v17  ;;  %v3214_v36 = vmax.f32 %v3164_v35, 0.0  ;;  %v3159_v37 = vadd.f32 %v5865_v41, %v3158_v18  ;;  %4899 = vmatprep.mubr.msk.f32.mxu1 %vm429_vm1, %v3211_v17 }
 0x676   :  { %v4851_v39 = vpop.f32.mrf.mxu0  ;;  %4900 = vmatmul.mubr.msk.f32.gmra.mxu1 %vm429_vm1, %v3212_v32 }
 0x677   :  { %3246 = vst.msk [vmem:[%s6230_s8 + $0xd8] sm:$0xff] %vm429_vm1, %v3214_v36  ;;  %v3213_v40 = vmax.f32 %v3159_v37, 0.0  ;;  %v3174_v42 = vadd.f32 %v4851_v39, %v5865_v41 }
 0x678   :  { %v3168_v43 = vpop.f32.mrf.mxu0 }
 0x679   :  { %3245 = vst.msk [vmem:[%s6230_s8 + $0xd0] sm:$0xff] %vm429_vm1, %v3213_v40  ;;  %v3216_v19 = vmax.f32 %v3174_v42, 0.0  ;;  %v3169_v44 = vadd.f32 %v5865_v41, %v3168_v43  ;;  %4902 = vmatprep.mubr.msk.f32.mxu1 %vm429_vm1, %v3213_v40 }
 0x67a   :  { %v4854_v22 = vpop.f32.mrf.mxu0  ;;  %4903 = vmatmul.mubr.msk.f32.gmra.mxu1 %vm429_vm1, %v3214_v36 }
 0x67b   :  { %3248 = vst.msk [vmem:[%s6230_s8 + $0xe8] sm:$0xff] %vm429_vm1, %v3216_v19  ;;  %v3215_v20 = vmax.f32 %v3169_v44, 0.0  ;;  %v3184_v45 = vadd.f32 %v4854_v22, %v5865_v41 }
 0x67c   :  { %v3178_v46 = vpop.f32.mrf.mxu0 }
 0x67d   :  { %3247 = vst.msk [vmem:[%s6230_s8 + $0xe0] sm:$0xff] %vm429_vm1, %v3215_v20  ;;  %v3218_v49 = vmax.f32 %v3184_v45, 0.0  ;;  %v3179_v50 = vadd.f32 %v5865_v41, %v3178_v46  ;;  %4905 = vmatprep.mubr.msk.f32.mxu1 %vm429_vm1, %v3215_v20  ;;  %v6062_v41 = vld [vmem:[%s6231_s6] ss:$0 sm:$0xff] }
 0x67e   :  { %4906 = vmatmul.mubr.msk.f32.gmra.mxu1 %vm429_vm1, %v3216_v19 }
 0x67f   :  { %3250 = vst.msk [vmem:[%s6230_s8 + $0xf8] sm:$0xff] %vm429_vm1, %v3218_v49  ;;  %v3217_v14 = vmax.f32 %v3179_v50, 0.0 }
 0x681   :  { %3249 = vst.msk [vmem:[%s6230_s8 + $0xf0] sm:$0xff] %vm429_vm1, %v3217_v14  ;;  %4908 = vmatprep.mubr.msk.f32.mxu1 %vm429_vm1, %v3217_v14 }
 0x682   :  { %4909 = vmatmul.mubr.msk.f32.gmra.mxu1 %vm429_vm1, %v3218_v49 }
 0x706   :  { %v4865_v28 = vpop.f32.mrf.mxu1 }
 0x707   :  { %v3430_v51 = vadd.f32 %v4865_v28, %v6062_v41 }
 0x708   :  { %v3424_v38 = vpop.f32.mrf.mxu1 }
 0x709   :  { %v3584_v53 = vmax.f32 %v3430_v51, 0.0  ;;  %v3425_v54 = vadd.f32 %v6062_v41, %v3424_v38 }
 0x70a   :  { %v4868_v55 = vpop.f32.mrf.mxu1 }
 0x70b   :  { %3617 = vst.msk [vmem:[%s6232_s7 + $0x8] sm:$0xff] %vm3615_vm2, %v3584_v53  ;;  %v3583_v56 = vmax.f32 %v3425_v54, 0.0  ;;  %v3440_v58 = vadd.f32 %v4868_v55, %v6062_v41 }
 0x70c   :  { %v3434_v59 = vpop.f32.mrf.mxu1 }
 0x70d   :  { %3616 = vst.msk [vmem:[%s6232_s7] sm:$0xff] %vm3615_vm2, %v3583_v56  ;;  %v3586_v48 = vmax.f32 %v3440_v58, 0.0  ;;  %v3435_v60 = vadd.f32 %v6062_v41, %v3434_v59 }
 0x70e   :  { %v4871_v57 = vpop.f32.mrf.mxu1 }
 0x70f   :  { %3619 = vst.msk [vmem:[%s6232_s7 + $0x18] sm:$0xff] %vm3615_vm2, %v3586_v48  ;;  %v3585_v61 = vmax.f32 %v3435_v60, 0.0  ;;  %v3450_v26 = vadd.f32 %v4871_v57, %v6062_v41 }
 0x710   :  { %v3444_v62 = vpop.f32.mrf.mxu1 }
 0x711   :  { %3618 = vst.msk [vmem:[%s6232_s7 + $0x10] sm:$0xff] %vm3615_vm2, %v3585_v61  ;;  %v3588_v63 = vmax.f32 %v3450_v26, 0.0  ;;  %v3445_v0 = vadd.f32 %v6062_v41, %v3444_v62 }
 0x712   :  { %v4874_v2 = vpop.f32.mrf.mxu1 }
 0x713   :  { %3621 = vst.msk [vmem:[%s6232_s7 + $0x28] sm:$0xff] %vm3615_vm2, %v3588_v63  ;;  %v3587_v3 = vmax.f32 %v3445_v0, 0.0  ;;  %v3460_v1 = vadd.f32 %v4874_v2, %v6062_v41 }
 0x714   :  { %v3454_v4 = vpop.f32.mrf.mxu1 }
 0x715   :  { %3620 = vst.msk [vmem:[%s6232_s7 + $0x20] sm:$0xff] %vm3615_vm2, %v3587_v3  ;;  %v3590_v29 = vmax.f32 %v3460_v1, 0.0  ;;  %v3455_v5 = vadd.f32 %v6062_v41, %v3454_v4 }
 0x716   :  { %v4877_v6 = vpop.f32.mrf.mxu1 }
 0x717   :  { %3623 = vst.msk [vmem:[%s6232_s7 + $0x38] sm:$0xff] %vm3615_vm2, %v3590_v29  ;;  %v3589_v7 = vmax.f32 %v3455_v5, 0.0  ;;  %v3470_v8 = vadd.f32 %v4877_v6, %v6062_v41 }
 0x718   :  { %v3464_v9 = vpop.f32.mrf.mxu1 }
 0x719   :  { %3622 = vst.msk [vmem:[%s6232_s7 + $0x30] sm:$0xff] %vm3615_vm2, %v3589_v7  ;;  %v3592_v10 = vmax.f32 %v3470_v8, 0.0  ;;  %v3465_v11 = vadd.f32 %v6062_v41, %v3464_v9 }
 0x71a   :  { %v4880_v12 = vpop.f32.mrf.mxu1 }
 0x71b   :  { %3625 = vst.msk [vmem:[%s6232_s7 + $0x48] sm:$0xff] %vm3615_vm2, %v3592_v10  ;;  %v3591_v13 = vmax.f32 %v3465_v11, 0.0  ;;  %v3480_v21 = vadd.f32 %v4880_v12, %v6062_v41 }
 0x71c   :  { %v3474_v23 = vpop.f32.mrf.mxu1 }
 0x71d   :  { %3624 = vst.msk [vmem:[%s6232_s7 + $0x40] sm:$0xff] %vm3615_vm2, %v3591_v13  ;;  %v3594_v47 = vmax.f32 %v3480_v21, 0.0  ;;  %v3475_v52 = vadd.f32 %v6062_v41, %v3474_v23 }
 0x71e   :  { %v4883_v24 = vpop.f32.mrf.mxu1 }
 0x71f   :  { %3627 = vst.msk [vmem:[%s6232_s7 + $0x58] sm:$0xff] %vm3615_vm2, %v3594_v47  ;;  %v3593_v15 = vmax.f32 %v3475_v52, 0.0  ;;  %v3490_v25 = vadd.f32 %v4883_v24, %v6062_v41 }
 0x720   :  { %v3484_v16 = vpop.f32.mrf.mxu1 }
 0x721   :  { %3626 = vst.msk [vmem:[%s6232_s7 + $0x50] sm:$0xff] %vm3615_vm2, %v3593_v15  ;;  %v3596_v27 = vmax.f32 %v3490_v25, 0.0  ;;  %v3485_v30 = vadd.f32 %v6062_v41, %v3484_v16 }
 0x722   :  { %v4886_v31 = vpop.f32.mrf.mxu1 }
 0x723   :  { %3629 = vst.msk [vmem:[%s6232_s7 + $0x68] sm:$0xff] %vm3615_vm2, %v3596_v27  ;;  %v3595_v32 = vmax.f32 %v3485_v30, 0.0  ;;  %v3500_v33 = vadd.f32 %v4886_v31, %v6062_v41 }
 0x724   :  { %v3494_v34 = vpop.f32.mrf.mxu1 }
 0x725   :  { %3628 = vst.msk [vmem:[%s6232_s7 + $0x60] sm:$0xff] %vm3615_vm2, %v3595_v32  ;;  %v3598_v17 = vmax.f32 %v3500_v33, 0.0  ;;  %v3495_v35 = vadd.f32 %v6062_v41, %v3494_v34 }
 0x726   :  { %v4889_v18 = vpop.f32.mrf.mxu1 }
 0x727   :  { %3631 = vst.msk [vmem:[%s6232_s7 + $0x78] sm:$0xff] %vm3615_vm2, %v3598_v17  ;;  %v3597_v36 = vmax.f32 %v3495_v35, 0.0  ;;  %v3510_v37 = vadd.f32 %v4889_v18, %v6062_v41 }
 0x728   :  { %v3504_v39 = vpop.f32.mrf.mxu1 }
 0x729   :  { %3630 = vst.msk [vmem:[%s6232_s7 + $0x70] sm:$0xff] %vm3615_vm2, %v3597_v36  ;;  %v3600_v40 = vmax.f32 %v3510_v37, 0.0  ;;  %v3505_v42 = vadd.f32 %v6062_v41, %v3504_v39 }
 0x72a   :  { %v4892_v43 = vpop.f32.mrf.mxu1 }
 0x72b   :  { %3633 = vst.msk [vmem:[%s6232_s7 + $0x88] sm:$0xff] %vm3615_vm2, %v3600_v40  ;;  %v3599_v19 = vmax.f32 %v3505_v42, 0.0  ;;  %v3520_v44 = vadd.f32 %v4892_v43, %v6062_v41 }
 0x72c   :  { %v3514_v22 = vpop.f32.mrf.mxu1 }
 0x72d   :  { %3632 = vst.msk [vmem:[%s6232_s7 + $0x80] sm:$0xff] %vm3615_vm2, %v3599_v19  ;;  %v3602_v20 = vmax.f32 %v3520_v44, 0.0  ;;  %v3515_v45 = vadd.f32 %v6062_v41, %v3514_v22 }
 0x72e   :  { %v4895_v46 = vpop.f32.mrf.mxu1 }
 0x72f   :  { %3635 = vst.msk [vmem:[%s6232_s7 + $0x98] sm:$0xff] %vm3615_vm2, %v3602_v20  ;;  %v3601_v49 = vmax.f32 %v3515_v45, 0.0  ;;  %v3530_v50 = vadd.f32 %v4895_v46, %v6062_v41 }
 0x730   :  { %v3524_v14 = vpop.f32.mrf.mxu1 }
 0x731   :  { %3634 = vst.msk [vmem:[%s6232_s7 + $0x90] sm:$0xff] %vm3615_vm2, %v3601_v49  ;;  %v3604_v28 = vmax.f32 %v3530_v50, 0.0  ;;  %v3525_v51 = vadd.f32 %v6062_v41, %v3524_v14 }
 0x732   :  { %v4898_v38 = vpop.f32.mrf.mxu1 }
 0x733   :  { %3637 = vst.msk [vmem:[%s6232_s7 + $0xa8] sm:$0xff] %vm3615_vm2, %v3604_v28  ;;  %v3603_v53 = vmax.f32 %v3525_v51, 0.0  ;;  %v3540_v54 = vadd.f32 %v4898_v38, %v6062_v41 }
 0x734   :  { %v3534_v55 = vpop.f32.mrf.mxu1 }
 0x735   :  { %3636 = vst.msk [vmem:[%s6232_s7 + $0xa0] sm:$0xff] %vm3615_vm2, %v3603_v53  ;;  %v3606_v56 = vmax.f32 %v3540_v54, 0.0  ;;  %v3535_v58 = vadd.f32 %v6062_v41, %v3534_v55 }
 0x736   :  { %v4901_v59 = vpop.f32.mrf.mxu1 }
 0x737   :  { %3639 = vst.msk [vmem:[%s6232_s7 + $0xb8] sm:$0xff] %vm3615_vm2, %v3606_v56  ;;  %v3605_v48 = vmax.f32 %v3535_v58, 0.0  ;;  %v3550_v60 = vadd.f32 %v4901_v59, %v6062_v41 }
 0x738   :  { %v3544_v57 = vpop.f32.mrf.mxu1 }
 0x739   :  { %3638 = vst.msk [vmem:[%s6232_s7 + $0xb0] sm:$0xff] %vm3615_vm2, %v3605_v48  ;;  %v3608_v61 = vmax.f32 %v3550_v60, 0.0  ;;  %v3545_v26 = vadd.f32 %v6062_v41, %v3544_v57 }
 0x73a   :  { %v4904_v62 = vpop.f32.mrf.mxu1 }
 0x73b   :  { %3641 = vst.msk [vmem:[%s6232_s7 + $0xc8] sm:$0xff] %vm3615_vm2, %v3608_v61  ;;  %v3607_v63 = vmax.f32 %v3545_v26, 0.0  ;;  %v3560_v0 = vadd.f32 %v4904_v62, %v6062_v41 }
 0x73c   :  { %v3554_v2 = vpop.f32.mrf.mxu1 }
 0x73d   :  { %3640 = vst.msk [vmem:[%s6232_s7 + $0xc0] sm:$0xff] %vm3615_vm2, %v3607_v63  ;;  %v3610_v3 = vmax.f32 %v3560_v0, 0.0  ;;  %v3555_v1 = vadd.f32 %v6062_v41, %v3554_v2 }
 0x73e   :  { %v4907_v4 = vpop.f32.mrf.mxu1 }
 0x73f   :  { %3643 = vst.msk [vmem:[%s6232_s7 + $0xd8] sm:$0xff] %vm3615_vm2, %v3610_v3  ;;  %v3609_v29 = vmax.f32 %v3555_v1, 0.0  ;;  %v3570_v5 = vadd.f32 %v4907_v4, %v6062_v41 }
 0x740   :  { %v3564_v6 = vpop.f32.mrf.mxu1 }
 0x741   :  { %3642 = vst.msk [vmem:[%s6232_s7 + $0xd0] sm:$0xff] %vm3615_vm2, %v3609_v29  ;;  %v3612_v7 = vmax.f32 %v3570_v5, 0.0  ;;  %v3565_v8 = vadd.f32 %v6062_v41, %v3564_v6 }
 0x742   :  { %v4910_v9 = vpop.f32.mrf.mxu1 }
 0x743   :  { %3645 = vst.msk [vmem:[%s6232_s7 + $0xe8] sm:$0xff] %vm3615_vm2, %v3612_v7  ;;  %v3611_v10 = vmax.f32 %v3565_v8, 0.0  ;;  %v3580_v11 = vadd.f32 %v4910_v9, %v6062_v41 }
 0x744   :  { %v3574_v12 = vpop.f32.mrf.mxu1 }
 0x745   :  { %3644 = vst.msk [vmem:[%s6232_s7 + $0xe0] sm:$0xff] %vm3615_vm2, %v3611_v10  ;;  %v3614_v13 = vmax.f32 %v3580_v11, 0.0  ;;  %v3575_v21 = vadd.f32 %v6062_v41, %v3574_v12 }
 0x747   :  { %3647 = vst.msk [vmem:[%s6232_s7 + $0xf8] sm:$0xff] %vm3615_vm2, %v3614_v13  ;;  %v3613_v23 = vmax.f32 %v3575_v21, 0.0 }
 0x749   :  { %3646 = vst.msk [vmem:[%s6232_s7 + $0xf0] sm:$0xff] %vm3615_vm2, %v3613_v23 }

</bundles_post_ra>
